<compile_context>
chip_gen: v7x
topology: tpu7x:2x2x1
jax: 0.10.0
libtpu: 0.0.40
codegen_flags: <defaults>
</compile_context>

<pallas_src>
import jax
import jax.numpy as jnp
from jax.experimental import pallas as pl
from jax.experimental.pallas import tpu as pltpu


# ----------------------------------------------------------------------------
# Pallas kernel: two stacked ContinuousConvolutions on one block of M = bb*N
# masked points (whole batch by default).
# ----------------------------------------------------------------------------
def _cc_branch_kernel(feats_ref, rel_ref, gidx_ref,
                      wf1_ref, wr1_ref, b1_ref,
                      wf2_ref, wr2_ref, b2_ref,
                      out_ref, oh_ref):
    M, C = feats_ref.shape          # M = bb * N rows in this block
    K = gidx_ref.shape[1]

    # ---- K one-hot gather matrices, built ONCE and reused by both layers ----
    col_ids = jax.lax.broadcasted_iota(jnp.int32, (M, M), 1)   # col_ids[i, j] = j
    for k in range(K):                                         # K small & static
        sel = gidx_ref[:, k:k + 1]                             # (M, 1) block-local ids
        oh_ref[k] = (col_ids == sel).astype(jnp.float32)       # (M, M)

    rel = rel_ref[...].astype(jnp.float32)                     # (M, 3K)
    f0 = feats_ref[...].astype(jnp.float32)                    # (M, C)

    def layer(f, wf_ref, wr_ref, b_ref):
        # weights first: one lane-dense matmul, then gather the C-wide results.
        p = jnp.dot(f, wf_ref[...].astype(jnp.float32),
                    preferred_element_type=jnp.float32)        # (M, K*C)
        h = jnp.dot(rel, wr_ref[...].astype(jnp.float32),
                    preferred_element_type=jnp.float32)        # (M, C) rel-coord term
        h = h + b_ref[...].astype(jnp.float32)
        for k in range(K):
            h = h + jnp.dot(oh_ref[k], p[:, k * C:(k + 1) * C],
                            preferred_element_type=jnp.float32)
        return jnp.maximum(h, 0.0) + f                          # ReLU + residual

    h1 = layer(f0, wf1_ref, wr1_ref, b1_ref)
    h2 = layer(h1, wf2_ref, wr2_ref, b2_ref)
    out_ref[...] = h2.astype(out_ref.dtype)


def continuous_branch_pallas(feats_mask, coors, indices,
                             wf1, wr1, b1, wf2, wr2, b2, *, batch_block=None):
    """feats_mask: (B, N, C), coors: (B, N, 3), indices: (B, N, K) int32."""
    B, N, C = feats_mask.shape
    K = indices.shape[-1]
    bb = B if batch_block is None else batch_block
    assert B % bb == 0, "batch_block must divide B"
    M = bb * N
    grid = (B // bb,)

    # glue: data-dependent neighbour-coordinate gather + relative coords (tiny)
    nbr = jnp.take_along_axis(coors, indices.reshape(B, N * K)[:, :, None], axis=1)
    rel = (coors[:, :, None, :] - nbr.reshape(B, N, K, 3)).reshape(B * N, K * 3)

    # flatten features; make knn indices block-local row ids
    feats_flat = feats_mask.reshape(B * N, C)
    local_off = ((jnp.arange(B, dtype=jnp.int32) % bb) * N)[:, None, None]
    gidx = (indices.astype(jnp.int32) + local_off).reshape(B * N, K)

    row = lambda i: (i, 0)
    full = lambda i: (0, 0)

    out = pl.pallas_call(
        _cc_branch_kernel,
        out_shape=jax.ShapeDtypeStruct((B * N, C), feats_mask.dtype),
        grid=grid,
        in_specs=[
            pl.BlockSpec((M, C), row),          # masked-point features (flat)
            pl.BlockSpec((M, 3 * K), row),      # relative coordinates
            pl.BlockSpec((M, K), row),          # block-local knn indices
            pl.BlockSpec((C, K * C), full),     # layer-1 fused feature weights
            pl.BlockSpec((3 * K, C), full),     # layer-1 rel-coord weights
            pl.BlockSpec((1, C), full),         # layer-1 bias
            pl.BlockSpec((C, K * C), full),     # layer-2 fused feature weights
            pl.BlockSpec((3 * K, C), full),     # layer-2 rel-coord weights
            pl.BlockSpec((1, C), full),         # layer-2 bias
        ],
        out_specs=pl.BlockSpec((M, C), row),
        scratch_shapes=[pltpu.VMEM((K, M, M), jnp.float32)],   # one-hot gathers
        compiler_params=pltpu.CompilerParams(dimension_semantics=("parallel",)),
    )(feats_flat, rel, gidx, wf1, wr1, b1, wf2, wr2, b2)
    return out.reshape(B, N, C)


# ----------------------------------------------------------------------------
# Weight preparation (done ONCE, outside the jitted forward path).
# ----------------------------------------------------------------------------
def prepare_cc_weights(w_t, b, n_feat, k_number):
    """w_t: (K*(C+3), C) = Linear.weight.T, b: (C,).
    Returns (wf, wr, b2d):
      wf: (C, K*C)  per-neighbour feature blocks [W_0 | W_1 | ...] (weights-first)
      wr: (K*3, C)  per-neighbour / per-axis rel-coord weight rows
      b2d: (1, C)
    """
    C, K = n_feat, k_number
    w = w_t.reshape(K, C + 3, C)
    wf = jnp.transpose(w[:, :C, :], (1, 0, 2)).reshape(C, K * C)
    wr = w[:, C:, :].reshape(K * 3, C)
    return wf, wr, b.reshape(1, C)


# ----------------------------------------------------------------------------
# Module-level wrapper (glue: mask select / scatter, NCHW <-> channels-last).
# ----------------------------------------------------------------------------
def three_d_branch(feats, mask, coors, indices, wf1, wr1, b1, wf2, wr2, b2):
    """feats: B x C x H x W, mask: B x H x W (exactly N True per image),
    coors: B x N x 3, indices: B x N x K.  Returns B x C x H x W."""
    B, C, H, W = feats.shape
    N = coors.shape[1]

    # glue: emulate feats.permute(0,2,3,1)[mask].view(B, -1, C)
    feats_perm = jnp.transpose(feats, (0, 2, 3, 1)).reshape(B, H * W, C)
    mask_flat = mask.reshape(B, H * W)
    pos = jnp.argsort(jnp.logical_not(mask_flat), axis=1, stable=True)[:, :N]   # (B, N)
    feats_mask = jnp.take_along_axis(feats_perm, pos[:, :, None], axis=1)       # (B, N, C)

    br_3d = continuous_branch_pallas(feats_mask, coors, indices,
                                     wf1, wr1, b1, wf2, wr2, b2)                # (B, N, C)

    # glue: out = zeros; out[mask] = br_3d; permute back to NCHW
    out = jnp.zeros((B, H * W, C), feats.dtype)
    out = out.at[jnp.arange(B)[:, None], pos].set(br_3d)
    return out.reshape(B, H, W, C).transpose(0, 3, 1, 2)


# ----------------------------------------------------------------------------
# Pure-JAX reference (for correctness check only).
# ----------------------------------------------------------------------------
def _cc_layer_ref(feats, coors, indices, w_t, b):
    B, N, C = feats.shape
    K = indices.shape[-1]
    idx_flat = indices.reshape(B, N * K)
    nf = jnp.take_along_axis(feats, idx_flat[:, :, None], axis=1).reshape(B, N, K, C)
    nc = jnp.take_along_axis(coors, idx_flat[:, :, None], axis=1).reshape(B, N, K, 3)
    rel = coors[:, :, None, :] - nc
    cat = jnp.concatenate([nf, rel], axis=-1).reshape(B, N, K * (C + 3))
    out = jnp.maximum(jnp.einsum("bnf,fc->bnc", cat, w_t) + b, 0.0)
    return out + feats


def three_d_branch_ref(feats, mask, coors, indices, w1t, b1, w2t, b2):
    B, C, H, W = feats.shape
    N = coors.shape[1]
    fp = jnp.transpose(feats, (0, 2, 3, 1)).reshape(B, H * W, C)
    mflat = mask.reshape(B, H * W)
    pos = jnp.argsort(jnp.logical_not(mflat), axis=1, stable=True)[:, :N]
    fm = jnp.take_along_axis(fp, pos[:, :, None], axis=1)
    h = _cc_layer_ref(fm, coors, indices, w1t, b1)
    h = _cc_layer_ref(h, coors, indices, w2t, b2)
    out = jnp.zeros((B, H * W, C), feats.dtype)
    out = out.at[jnp.arange(B)[:, None], pos].set(h)
    return out.reshape(B, H, W, C).transpose(0, 3, 1, 2)


# ----------------------------------------------------------------------------
if __name__ == "__main__":
    B, C, H, W = 2, 32, 16, 16
    N, K = 64, 4

    key = jax.random.PRNGKey(0)
    kf, kc, ki, km, kw1, kb1, kw2, kb2 = jax.random.split(key, 8)

    feats = jax.random.normal(kf, (B, C, H, W), jnp.float32)
    coors = jax.random.normal(kc, (B, N, 3), jnp.float32)
    indices = jax.random.randint(ki, (B, N, K), 0, N, jnp.int32)

    # mask with exactly N True pixels per image
    perms = jax.vmap(lambda k: jax.random.permutation(k, H * W))(jax.random.split(km, B))
    sel = perms[:, :N]
    mask = (jnp.zeros((B, H * W), bool)
            .at[jnp.arange(B)[:, None], sel].set(True)
            .reshape(B, H, W))

    # deterministic parameters (PyTorch nn.Linear default init: U(-1/sqrt(fan), 1/sqrt(fan)))
    fan_in = K * (C + 3)
    bound = 1.0 / (fan_in ** 0.5)
    w1t = jax.random.uniform(kw1, (fan_in, C), jnp.float32, -bound, bound)  # = W1^T
    b1 = jax.random.uniform(kb1, (C,), jnp.float32, -bound, bound)
    w2t = jax.random.uniform(kw2, (fan_in, C), jnp.float32, -bound, bound)  # = W2^T
    b2 = jax.random.uniform(kb2, (C,), jnp.float32, -bound, bound)

    # split/fuse the weights once, outside the jitted forward path
    wf1, wr1, b1p = prepare_cc_weights(w1t, b1, C, K)
    wf2, wr2, b2p = prepare_cc_weights(w2t, b2, C, K)

    run = jax.jit(three_d_branch)
    out = run(feats, mask, coors, indices, wf1, wr1, b1p, wf2, wr2, b2p)
    out = jax.block_until_ready(out)

    ref = three_d_branch_ref(feats, mask, coors, indices, w1t, b1, w2t, b2)
    if not jnp.allclose(out, ref, atol=1e-4, rtol=1e-4):
        raise AssertionError("Pallas kernel output mismatch vs JAX reference")

    print("KERNEL_OK")
</pallas_src>

<mosaic_0001>
module attributes {stable_mosaic.version = 11 : i64} {
  func.func @_cc_branch_kernel(%arg0: i32, %arg1: memref<128x32xf32, #tpu.memory_space<vmem>>, %arg2: memref<128x12xf32, #tpu.memory_space<vmem>>, %arg3: memref<128x4xi32, #tpu.memory_space<vmem>>, %arg4: memref<32x128xf32, #tpu.memory_space<vmem>>, %arg5: memref<12x32xf32, #tpu.memory_space<vmem>>, %arg6: memref<1x32xf32, #tpu.memory_space<vmem>>, %arg7: memref<32x128xf32, #tpu.memory_space<vmem>>, %arg8: memref<12x32xf32, #tpu.memory_space<vmem>>, %arg9: memref<1x32xf32, #tpu.memory_space<vmem>>, %arg10: memref<128x32xf32, #tpu.memory_space<vmem>>, %arg11: memref<4x128x128xf32, #tpu.memory_space<vmem>>) attributes {dimension_semantics = [#tpu.dimension_semantics<parallel>], iteration_bounds = array<i64: 1>, scalar_prefetch = 0 : i64, scratch_operands = 1 : i64, tpu.core_type = #tpu.core_type<tc>, window_params = [{transform_indices = @transform_0, window_bounds = array<i64: 128, 32>}, {transform_indices = @transform_1, window_bounds = array<i64: 128, 12>}, {transform_indices = @transform_2, window_bounds = array<i64: 128, 4>}, {pipeline_mode = #tpu.pipeline_mode<synchronous>, transform_indices = @transform_3, window_bounds = array<i64: 32, 128>}, {pipeline_mode = #tpu.pipeline_mode<synchronous>, transform_indices = @transform_4, window_bounds = array<i64: 12, 32>}, {pipeline_mode = #tpu.pipeline_mode<synchronous>, transform_indices = @transform_5, window_bounds = array<i64: 1, 32>}, {pipeline_mode = #tpu.pipeline_mode<synchronous>, transform_indices = @transform_6, window_bounds = array<i64: 32, 128>}, {pipeline_mode = #tpu.pipeline_mode<synchronous>, transform_indices = @transform_7, window_bounds = array<i64: 12, 32>}, {pipeline_mode = #tpu.pipeline_mode<synchronous>, transform_indices = @transform_8, window_bounds = array<i64: 1, 32>}, {transform_indices = @transform_9, window_bounds = array<i64: 128, 32>}]} {
    %0 = tpu.iota {dimensions = array<i32: 1>} : vector<128x128xi32>
    %c0 = arith.constant 0 : index
    %c0_0 = arith.constant 0 : index
    %1 = vector.load %arg3[%c0, %c0_0] : memref<128x4xi32, #tpu.memory_space<vmem>>, vector<128x1xi32>
    %2 = vector.broadcast %1 : vector<128x1xi32> to vector<128x128xi32>
    %3 = arith.cmpi eq, %0, %2 : vector<128x128xi32>
    %4 = arith.extui %3 : vector<128x128xi1> to vector<128x128xi32>
    %5 = arith.sitofp %4 : vector<128x128xi32> to vector<128x128xf32>
    %c0_1 = arith.constant 0 : index
    %c0_2 = arith.constant 0 : index
    %c0_3 = arith.constant 0 : index
    %6 = vector.load %arg11[%c0_1, %c0_2, %c0_3] : memref<4x128x128xf32, #tpu.memory_space<vmem>>, vector<1x128x128xf32>
    %7 = vector.shape_cast %6 : vector<1x128x128xf32> to vector<128x128xf32>
    %8 = vector.shape_cast %5 : vector<128x128xf32> to vector<1x128x128xf32>
    tpu.vector_store %arg11[%c0_1, %c0_2, %c0_3], %8 {strides = array<i32>} : memref<4x128x128xf32, #tpu.memory_space<vmem>>, vector<1x128x128xf32>,
    %c0_4 = arith.constant 0 : index
    %c1 = arith.constant 1 : index
    %9 = vector.load %arg3[%c0_4, %c1] : memref<128x4xi32, #tpu.memory_space<vmem>>, vector<128x1xi32>
    %10 = vector.broadcast %9 : vector<128x1xi32> to vector<128x128xi32>
    %11 = arith.cmpi eq, %0, %10 : vector<128x128xi32>
    %12 = arith.extui %11 : vector<128x128xi1> to vector<128x128xi32>
    %13 = arith.sitofp %12 : vector<128x128xi32> to vector<128x128xf32>
    %c1_5 = arith.constant 1 : index
    %c0_6 = arith.constant 0 : index
    %c0_7 = arith.constant 0 : index
    %14 = vector.load %arg11[%c1_5, %c0_6, %c0_7] : memref<4x128x128xf32, #tpu.memory_space<vmem>>, vector<1x128x128xf32>
    %15 = vector.shape_cast %14 : vector<1x128x128xf32> to vector<128x128xf32>
    %16 = vector.shape_cast %13 : vector<128x128xf32> to vector<1x128x128xf32>
    tpu.vector_store %arg11[%c1_5, %c0_6, %c0_7], %16 {strides = array<i32>} : memref<4x128x128xf32, #tpu.memory_space<vmem>>, vector<1x128x128xf32>,
    %c0_8 = arith.constant 0 : index
    %c2 = arith.constant 2 : index
    %17 = vector.load %arg3[%c0_8, %c2] : memref<128x4xi32, #tpu.memory_space<vmem>>, vector<128x1xi32>
    %18 = vector.broadcast %17 : vector<128x1xi32> to vector<128x128xi32>
    %19 = arith.cmpi eq, %0, %18 : vector<128x128xi32>
    %20 = arith.extui %19 : vector<128x128xi1> to vector<128x128xi32>
    %21 = arith.sitofp %20 : vector<128x128xi32> to vector<128x128xf32>
    %c2_9 = arith.constant 2 : index
    %c0_10 = arith.constant 0 : index
    %c0_11 = arith.constant 0 : index
    %22 = vector.load %arg11[%c2_9, %c0_10, %c0_11] : memref<4x128x128xf32, #tpu.memory_space<vmem>>, vector<1x128x128xf32>
    %23 = vector.shape_cast %22 : vector<1x128x128xf32> to vector<128x128xf32>
    %24 = vector.shape_cast %21 : vector<128x128xf32> to vector<1x128x128xf32>
    tpu.vector_store %arg11[%c2_9, %c0_10, %c0_11], %24 {strides = array<i32>} : memref<4x128x128xf32, #tpu.memory_space<vmem>>, vector<1x128x128xf32>,
    %c0_12 = arith.constant 0 : index
    %c3 = arith.constant 3 : index
    %25 = vector.load %arg3[%c0_12, %c3] : memref<128x4xi32, #tpu.memory_space<vmem>>, vector<128x1xi32>
    %26 = vector.broadcast %25 : vector<128x1xi32> to vector<128x128xi32>
    %27 = arith.cmpi eq, %0, %26 : vector<128x128xi32>
    %28 = arith.extui %27 : vector<128x128xi1> to vector<128x128xi32>
    %29 = arith.sitofp %28 : vector<128x128xi32> to vector<128x128xf32>
    %c3_13 = arith.constant 3 : index
    %c0_14 = arith.constant 0 : index
    %c0_15 = arith.constant 0 : index
    %30 = vector.load %arg11[%c3_13, %c0_14, %c0_15] : memref<4x128x128xf32, #tpu.memory_space<vmem>>, vector<1x128x128xf32>
    %31 = vector.shape_cast %30 : vector<1x128x128xf32> to vector<128x128xf32>
    %32 = vector.shape_cast %29 : vector<128x128xf32> to vector<1x128x128xf32>
    tpu.vector_store %arg11[%c3_13, %c0_14, %c0_15], %32 {strides = array<i32>} : memref<4x128x128xf32, #tpu.memory_space<vmem>>, vector<1x128x128xf32>,
    %c0_16 = arith.constant 0 : index
    %c0_17 = arith.constant 0 : index
    %33 = vector.load %arg2[%c0_16, %c0_17] : memref<128x12xf32, #tpu.memory_space<vmem>>, vector<128x12xf32>
    %c0_18 = arith.constant 0 : index
    %c0_19 = arith.constant 0 : index
    %34 = vector.load %arg1[%c0_18, %c0_19] : memref<128x32xf32, #tpu.memory_space<vmem>>, vector<128x32xf32>
    %c0_20 = arith.constant 0 : index
    %c0_21 = arith.constant 0 : index
    %35 = vector.load %arg4[%c0_20, %c0_21] : memref<32x128xf32, #tpu.memory_space<vmem>>, vector<32x128xf32>
    %cst = arith.constant dense<0.000000e+00> : vector<128x128xf32>
    %36 = tpu.matmul %34, %35, %cst {dimension_numbers = #tpu.dot_dimension_numbers<[1], [0], [0], [1], [0, 0, 1, 1], [], []>} : vector<128x32xf32>, vector<32x128xf32>, vector<128x128xf32> -> vector<128x128xf32>
    %c0_22 = arith.constant 0 : index
    %c0_23 = arith.constant 0 : index
    %37 = vector.load %arg5[%c0_22, %c0_23] : memref<12x32xf32, #tpu.memory_space<vmem>>, vector<12x32xf32>
    %cst_24 = arith.constant dense<0.000000e+00> : vector<128x32xf32>
    %38 = tpu.matmul %33, %37, %cst_24 {dimension_numbers = #tpu.dot_dimension_numbers<[1], [0], [0], [1], [0, 0, 1, 1], [], []>} : vector<128x12xf32>, vector<12x32xf32>, vector<128x32xf32> -> vector<128x32xf32>
    %c0_25 = arith.constant 0 : index
    %c0_26 = arith.constant 0 : index
    %39 = vector.load %arg6[%c0_25, %c0_26] : memref<1x32xf32, #tpu.memory_space<vmem>>, vector<1x32xf32>
    %40 = vector.broadcast %39 : vector<1x32xf32> to vector<128x32xf32>
    %41 = arith.addf %38, %40 : vector<128x32xf32>
    %c0_27 = arith.constant 0 : index
    %c0_28 = arith.constant 0 : index
    %c0_29 = arith.constant 0 : index
    %42 = vector.load %arg11[%c0_27, %c0_28, %c0_29] : memref<4x128x128xf32, #tpu.memory_space<vmem>>, vector<1x128x128xf32>
    %43 = vector.shape_cast %42 : vector<1x128x128xf32> to vector<128x128xf32>
    %44 = vector.extract_strided_slice %36 {offsets = [0, 0], sizes = [128, 32], strides = [1, 1]} : vector<128x128xf32> to vector<128x32xf32>
    %cst_30 = arith.constant dense<0.000000e+00> : vector<128x32xf32>
    %45 = tpu.matmul %43, %44, %cst_30 {dimension_numbers = #tpu.dot_dimension_numbers<[1], [0], [0], [1], [0, 0, 1, 1], [], []>} : vector<128x128xf32>, vector<128x32xf32>, vector<128x32xf32> -> vector<128x32xf32>
    %46 = arith.addf %41, %45 : vector<128x32xf32>
    %c1_31 = arith.constant 1 : index
    %c0_32 = arith.constant 0 : index
    %c0_33 = arith.constant 0 : index
    %47 = vector.load %arg11[%c1_31, %c0_32, %c0_33] : memref<4x128x128xf32, #tpu.memory_space<vmem>>, vector<1x128x128xf32>
    %48 = vector.shape_cast %47 : vector<1x128x128xf32> to vector<128x128xf32>
    %49 = vector.extract_strided_slice %36 {offsets = [0, 32], sizes = [128, 32], strides = [1, 1]} : vector<128x128xf32> to vector<128x32xf32>
    %cst_34 = arith.constant dense<0.000000e+00> : vector<128x32xf32>
    %50 = tpu.matmul %48, %49, %cst_34 {dimension_numbers = #tpu.dot_dimension_numbers<[1], [0], [0], [1], [0, 0, 1, 1], [], []>} : vector<128x128xf32>, vector<128x32xf32>, vector<128x32xf32> -> vector<128x32xf32>
    %51 = arith.addf %46, %50 : vector<128x32xf32>
    %c2_35 = arith.constant 2 : index
    %c0_36 = arith.constant 0 : index
    %c0_37 = arith.constant 0 : index
    %52 = vector.load %arg11[%c2_35, %c0_36, %c0_37] : memref<4x128x128xf32, #tpu.memory_space<vmem>>, vector<1x128x128xf32>
    %53 = vector.shape_cast %52 : vector<1x128x128xf32> to vector<128x128xf32>
    %54 = vector.extract_strided_slice %36 {offsets = [0, 64], sizes = [128, 32], strides = [1, 1]} : vector<128x128xf32> to vector<128x32xf32>
    %cst_38 = arith.constant dense<0.000000e+00> : vector<128x32xf32>
    %55 = tpu.matmul %53, %54, %cst_38 {dimension_numbers = #tpu.dot_dimension_numbers<[1], [0], [0], [1], [0, 0, 1, 1], [], []>} : vector<128x128xf32>, vector<128x32xf32>, vector<128x32xf32> -> vector<128x32xf32>
    %56 = arith.addf %51, %55 : vector<128x32xf32>
    %c3_39 = arith.constant 3 : index
    %c0_40 = arith.constant 0 : index
    %c0_41 = arith.constant 0 : index
    %57 = vector.load %arg11[%c3_39, %c0_40, %c0_41] : memref<4x128x128xf32, #tpu.memory_space<vmem>>, vector<1x128x128xf32>
    %58 = vector.shape_cast %57 : vector<1x128x128xf32> to vector<128x128xf32>
    %59 = vector.extract_strided_slice %36 {offsets = [0, 96], sizes = [128, 32], strides = [1, 1]} : vector<128x128xf32> to vector<128x32xf32>
    %cst_42 = arith.constant dense<0.000000e+00> : vector<128x32xf32>
    %60 = tpu.matmul %58, %59, %cst_42 {dimension_numbers = #tpu.dot_dimension_numbers<[1], [0], [0], [1], [0, 0, 1, 1], [], []>} : vector<128x128xf32>, vector<128x32xf32>, vector<128x32xf32> -> vector<128x32xf32>
    %61 = arith.addf %56, %60 : vector<128x32xf32>
    %cst_43 = arith.constant 0.000000e+00 : f32
    %62 = vector.broadcast %cst_43 : f32 to vector<128x32xf32>
    %63 = arith.maximumf %61, %62 : vector<128x32xf32>
    %64 = arith.addf %63, %34 : vector<128x32xf32>
    %c0_44 = arith.constant 0 : index
    %c0_45 = arith.constant 0 : index
    %65 = vector.load %arg7[%c0_44, %c0_45] : memref<32x128xf32, #tpu.memory_space<vmem>>, vector<32x128xf32>
    %cst_46 = arith.constant dense<0.000000e+00> : vector<128x128xf32>
    %66 = tpu.matmul %64, %65, %cst_46 {dimension_numbers = #tpu.dot_dimension_numbers<[1], [0], [0], [1], [0, 0, 1, 1], [], []>} : vector<128x32xf32>, vector<32x128xf32>, vector<128x128xf32> -> vector<128x128xf32>
    %c0_47 = arith.constant 0 : index
    %c0_48 = arith.constant 0 : index
    %67 = vector.load %arg8[%c0_47, %c0_48] : memref<12x32xf32, #tpu.memory_space<vmem>>, vector<12x32xf32>
    %cst_49 = arith.constant dense<0.000000e+00> : vector<128x32xf32>
    %68 = tpu.matmul %33, %67, %cst_49 {dimension_numbers = #tpu.dot_dimension_numbers<[1], [0], [0], [1], [0, 0, 1, 1], [], []>} : vector<128x12xf32>, vector<12x32xf32>, vector<128x32xf32> -> vector<128x32xf32>
    %c0_50 = arith.constant 0 : index
    %c0_51 = arith.constant 0 : index
    %69 = vector.load %arg9[%c0_50, %c0_51] : memref<1x32xf32, #tpu.memory_space<vmem>>, vector<1x32xf32>
    %70 = vector.broadcast %69 : vector<1x32xf32> to vector<128x32xf32>
    %71 = arith.addf %68, %70 : vector<128x32xf32>
    %c0_52 = arith.constant 0 : index
    %c0_53 = arith.constant 0 : index
    %c0_54 = arith.constant 0 : index
    %72 = vector.load %arg11[%c0_52, %c0_53, %c0_54] : memref<4x128x128xf32, #tpu.memory_space<vmem>>, vector<1x128x128xf32>
    %73 = vector.shape_cast %72 : vector<1x128x128xf32> to vector<128x128xf32>
    %74 = vector.extract_strided_slice %66 {offsets = [0, 0], sizes = [128, 32], strides = [1, 1]} : vector<128x128xf32> to vector<128x32xf32>
    %cst_55 = arith.constant dense<0.000000e+00> : vector<128x32xf32>
    %75 = tpu.matmul %73, %74, %cst_55 {dimension_numbers = #tpu.dot_dimension_numbers<[1], [0], [0], [1], [0, 0, 1, 1], [], []>} : vector<128x128xf32>, vector<128x32xf32>, vector<128x32xf32> -> vector<128x32xf32>
    %76 = arith.addf %71, %75 : vector<128x32xf32>
    %c1_56 = arith.constant 1 : index
    %c0_57 = arith.constant 0 : index
    %c0_58 = arith.constant 0 : index
    %77 = vector.load %arg11[%c1_56, %c0_57, %c0_58] : memref<4x128x128xf32, #tpu.memory_space<vmem>>, vector<1x128x128xf32>
    %78 = vector.shape_cast %77 : vector<1x128x128xf32> to vector<128x128xf32>
    %79 = vector.extract_strided_slice %66 {offsets = [0, 32], sizes = [128, 32], strides = [1, 1]} : vector<128x128xf32> to vector<128x32xf32>
    %cst_59 = arith.constant dense<0.000000e+00> : vector<128x32xf32>
    %80 = tpu.matmul %78, %79, %cst_59 {dimension_numbers = #tpu.dot_dimension_numbers<[1], [0], [0], [1], [0, 0, 1, 1], [], []>} : vector<128x128xf32>, vector<128x32xf32>, vector<128x32xf32> -> vector<128x32xf32>
    %81 = arith.addf %76, %80 : vector<128x32xf32>
    %c2_60 = arith.constant 2 : index
    %c0_61 = arith.constant 0 : index
    %c0_62 = arith.constant 0 : index
    %82 = vector.load %arg11[%c2_60, %c0_61, %c0_62] : memref<4x128x128xf32, #tpu.memory_space<vmem>>, vector<1x128x128xf32>
    %83 = vector.shape_cast %82 : vector<1x128x128xf32> to vector<128x128xf32>
    %84 = vector.extract_strided_slice %66 {offsets = [0, 64], sizes = [128, 32], strides = [1, 1]} : vector<128x128xf32> to vector<128x32xf32>
    %cst_63 = arith.constant dense<0.000000e+00> : vector<128x32xf32>
    %85 = tpu.matmul %83, %84, %cst_63 {dimension_numbers = #tpu.dot_dimension_numbers<[1], [0], [0], [1], [0, 0, 1, 1], [], []>} : vector<128x128xf32>, vector<128x32xf32>, vector<128x32xf32> -> vector<128x32xf32>
    %86 = arith.addf %81, %85 : vector<128x32xf32>
    %c3_64 = arith.constant 3 : index
    %c0_65 = arith.constant 0 : index
    %c0_66 = arith.constant 0 : index
    %87 = vector.load %arg11[%c3_64, %c0_65, %c0_66] : memref<4x128x128xf32, #tpu.memory_space<vmem>>, vector<1x128x128xf32>
    %88 = vector.shape_cast %87 : vector<1x128x128xf32> to vector<128x128xf32>
    %89 = vector.extract_strided_slice %66 {offsets = [0, 96], sizes = [128, 32], strides = [1, 1]} : vector<128x128xf32> to vector<128x32xf32>
    %cst_67 = arith.constant dense<0.000000e+00> : vector<128x32xf32>
    %90 = tpu.matmul %88, %89, %cst_67 {dimension_numbers = #tpu.dot_dimension_numbers<[1], [0], [0], [1], [0, 0, 1, 1], [], []>} : vector<128x128xf32>, vector<128x32xf32>, vector<128x32xf32> -> vector<128x32xf32>
    %91 = arith.addf %86, %90 : vector<128x32xf32>
    %cst_68 = arith.constant 0.000000e+00 : f32
    %92 = vector.broadcast %cst_68 : f32 to vector<128x32xf32>
    %93 = arith.maximumf %91, %92 : vector<128x32xf32>
    %94 = arith.addf %93, %64 : vector<128x32xf32>
    %c0_69 = arith.constant 0 : index
    %c0_70 = arith.constant 0 : index
    %95 = vector.load %arg10[%c0_69, %c0_70] : memref<128x32xf32, #tpu.memory_space<vmem>>, vector<128x32xf32>
    tpu.vector_store %arg10[%c0_69, %c0_70], %94 {strides = array<i32>} : memref<128x32xf32, #tpu.memory_space<vmem>>, vector<128x32xf32>,
    return
  }
  func.func @transform_0(%arg0: i32) -> (i32, i32) {
    %c0_i32 = arith.constant 0 : i32
    %c0_i32_0 = arith.constant 0 : i32
    return %arg0, %c0_i32 : i32, i32
  }
  func.func @transform_1(%arg0: i32) -> (i32, i32) {
    %c0_i32 = arith.constant 0 : i32
    %c0_i32_0 = arith.constant 0 : i32
    return %arg0, %c0_i32 : i32, i32
  }
  func.func @transform_2(%arg0: i32) -> (i32, i32) {
    %c0_i32 = arith.constant 0 : i32
    %c0_i32_0 = arith.constant 0 : i32
    return %arg0, %c0_i32 : i32, i32
  }
  func.func @transform_3(%arg0: i32) -> (i32, i32) {
    %c0_i32 = arith.constant 0 : i32
    %c0_i32_0 = arith.constant 0 : i32
    %c0_i32_1 = arith.constant 0 : i32
    return %c0_i32, %c0_i32_0 : i32, i32
  }
  func.func @transform_4(%arg0: i32) -> (i32, i32) {
    %c0_i32 = arith.constant 0 : i32
    %c0_i32_0 = arith.constant 0 : i32
    %c0_i32_1 = arith.constant 0 : i32
    return %c0_i32, %c0_i32_0 : i32, i32
  }
  func.func @transform_5(%arg0: i32) -> (i32, i32) {
    %c0_i32 = arith.constant 0 : i32
    %c0_i32_0 = arith.constant 0 : i32
    %c0_i32_1 = arith.constant 0 : i32
    return %c0_i32, %c0_i32_0 : i32, i32
  }
  func.func @transform_6(%arg0: i32) -> (i32, i32) {
    %c0_i32 = arith.constant 0 : i32
    %c0_i32_0 = arith.constant 0 : i32
    %c0_i32_1 = arith.constant 0 : i32
    return %c0_i32, %c0_i32_0 : i32, i32
  }
  func.func @transform_7(%arg0: i32) -> (i32, i32) {
    %c0_i32 = arith.constant 0 : i32
    %c0_i32_0 = arith.constant 0 : i32
    %c0_i32_1 = arith.constant 0 : i32
    return %c0_i32, %c0_i32_0 : i32, i32
  }
  func.func @transform_8(%arg0: i32) -> (i32, i32) {
    %c0_i32 = arith.constant 0 : i32
    %c0_i32_0 = arith.constant 0 : i32
    %c0_i32_1 = arith.constant 0 : i32
    return %c0_i32, %c0_i32_0 : i32, i32
  }
  func.func @transform_9(%arg0: i32) -> (i32, i32) {
    %c0_i32 = arith.constant 0 : i32
    %c0_i32_0 = arith.constant 0 : i32
    return %arg0, %c0_i32 : i32, i32
  }
}

</mosaic_0001>

<bundles_post_ra>
// kernel: three_d_branch.1
= control target key start
LH: loop header
LB: loop body
LE: loop exit
PB: predicated region body
PF: predicated region fallthrough
CT: control target
= control target key end

     0   :  { %vm585_vm0 = vcmask 261120   ;;  %v4989_v3 = vmov 0   ;;  %v4990_v39 = vmov 1   ;;  %vm837_vm1 = vcmask 1043456   ;;  %s4993_s24 = smov 64   ;;  %s4994_s25 = smov 96   ;;  %s6554_s3 = inlined_call_operand.vmem [shape: f32[32,128], index: 3, kind: input, shape index: {}]   ;;  %s6555_s0 = inlined_call_operand.vmem [shape: f32[128,32], index: 0, kind: input, shape index: {}]   ;;  %s6556_s2 = inlined_call_operand.vmem [shape: s32[128,4], index: 2, kind: input, shape index: {}]   ;;  %s6557_s4 = inlined_call_operand.vmem [shape: f32[12,32], index: 4, kind: input, shape index: {}]   ;;  %s6558_s1 = inlined_call_operand.vmem [shape: f32[128,12], index: 1, kind: input, shape index: {}]   ;;  %s6559_s6 = inlined_call_operand.vmem [shape: f32[32,128], index: 6, kind: input, shape index: {}]   ;;  %s6560_s7 = inlined_call_operand.vmem [shape: f32[12,32], index: 7, kind: input, shape index: {}]   ;;  %s6561_s5 = inlined_call_operand.vmem [shape: f32[1,32], index: 5, kind: input, shape index: {}]   ;;  %s6562_s8 = inlined_call_operand.vmem [shape: f32[1,32], index: 8, kind: input, shape index: {}]   ;;  %s6563_s9 = inlined_call_operand.vmem [shape: f32[128,32], index: 9, kind: output, shape index: {}]  }
   0x1   :  { %v581_v0 = vld [vmem:[%s6554_s3] sm:$0xff]  ;;  %v582_v1 = vld [vmem:[%s6554_s3 + $0x8] sm:$0xff]  ;;  %v583_v2 = vld [vmem:[%s6554_s3 + $0x10] sm:$0xff]  ;;  %4709 = vset.pattern.permute.xlu0 %v4989_v3  ;;  %4710 = vset.pattern.permute.xlu1 %v4989_v3  ;;  %vm4991_vm2 = vmmov 1   ;;  %vm788_vm4 = vcmask 97280   ;;  %v32_v58 = vlaneseq  ;;  %v6623_v63 = vmov 1.0  }
   0x2   :  { %v4256_v4 = vpack.c.bf16 %v582_v1, %v581_v0  ;;  %v584_v5 = vld [vmem:[%s6554_s3 + $0x18] sm:$0xff]  ;;  %v565_v6 = vld [vmem:[%s6555_s0] sm:$0xff]  ;;  %v5073_v9 = vld [vmem:[%s6556_s2 + $0x10] sm:$0xff]  ;;  %s4996_s26 = smov 32  }
   0x3   :  { %v4260_v7 = vpack.c.bf16 %v584_v5, %v583_v2  ;;  %3696 = vmatprep.mubr.msk.f32.mxu1 %vm585_vm0, %v565_v6  ;;  %v5067_v8 = vld [vmem:[%s6556_s2] sm:$0xff]  ;;  %v566_v10 = vld [vmem:[%s6555_s0 + $0x8] sm:$0xff]  ;;  %57 = vperm.xlu1 %4710, %v5073_v9   ;;  %v567_v12 = vld [vmem:[%s6555_s0 + $0x10] sm:$0xff]  ;;  %v5309_v61 = vand.u32 127, %v32_v58 }
   0x4   :  { %4257 = vmatprep.subr.bf16.mxu1 %v4256_v4  ;;  %51 = vperm.xlu0 %4709, %v5067_v8   ;;  %v5082_v11 = vld [vmem:[%s6556_s2 + $0x8] sm:$0xff]  ;;  %v5090_v13 = vld [vmem:[%s6556_s2 + $0x18] sm:$0xff]  ;;  %v569_v16 = vld [vmem:[%s6555_s0 + $0x20] sm:$0xff] }
   0x5   :  { %4259 = vmatpush3.bf16.msra.mxu1 %v4256_v4  ;;  %v568_v14 = vld [vmem:[%s6555_s0 + $0x18] sm:$0xff]  ;;  %v5102_v15 = vld [vmem:[%s6556_s2 + $0x28] sm:$0xff]  ;;  %v5110_v17 = vld [vmem:[%s6556_s2 + $0x20] sm:$0xff] }
   0x6   :  { %4261 = vmatprep.subr.bf16.mxu1 %v4260_v7  ;;  %v570_v18 = vld [vmem:[%s6555_s0 + $0x28] sm:$0xff]  ;;  %v5122_v19 = vld [vmem:[%s6556_s2 + $0x30] sm:$0xff]  ;;  %v5130_v21 = vld [vmem:[%s6556_s2 + $0x38] sm:$0xff] }
   0x7   :  { %60 = vperm.xlu1 %4710, %v5090_v13   ;;  %v571_v20 = vld [vmem:[%s6555_s0 + $0x30] sm:$0xff]  ;;  %v572_v22 = vld [vmem:[%s6555_s0 + $0x38] sm:$0xff]  ;;  %v5142_v23 = vld [vmem:[%s6556_s2 + $0x48] sm:$0xff] }
   0x8   :  { %54 = vperm.xlu0 %4709, %v5082_v11   ;;  %v573_v24 = vld [vmem:[%s6555_s0 + $0x40] sm:$0xff]  ;;  %v574_v26 = vld [vmem:[%s6555_s0 + $0x48] sm:$0xff]  ;;  %v5162_v27 = vld [vmem:[%s6556_s2 + $0x50] sm:$0xff] }
   0x9   :  { %4263 = vmatpush3.bf16.msra.mxu1 %v4260_v7  ;;  %v5150_v25 = vld [vmem:[%s6556_s2 + $0x40] sm:$0xff]  ;;  %v575_v28 = vld [vmem:[%s6555_s0 + $0x50] sm:$0xff]  ;;  %v5170_v29 = vld [vmem:[%s6556_s2 + $0x58] sm:$0xff] }
   0xa   :  { %v576_v30 = vld [vmem:[%s6555_s0 + $0x58] sm:$0xff]  ;;  %v5182_v31 = vld [vmem:[%s6556_s2 + $0x68] sm:$0xff]  ;;  %v577_v32 = vld [vmem:[%s6555_s0 + $0x60] sm:$0xff] }
   0xb   :  { %63 = vperm.xlu1 %4710, %v5110_v17   ;;  %v5190_v33 = vld [vmem:[%s6556_s2 + $0x60] sm:$0xff]  ;;  %v578_v34 = vld [vmem:[%s6555_s0 + $0x68] sm:$0xff]  ;;  %v5202_v35 = vld [vmem:[%s6556_s2 + $0x70] sm:$0xff] }
   0xc   :  { %3697 = vmatmul.mubr.msk.f32.vlgmr.msra.gmra.mrb[0].mxu1 %vm585_vm0, %v566_v10  ;;  %66 = vperm.xlu0 %4709, %v5102_v15   ;;  %v579_v36 = vld [vmem:[%s6555_s0 + $0x70] sm:$0xff]  ;;  %v5210_v37 = vld [vmem:[%s6556_s2 + $0x78] sm:$0xff]  ;;  %v779_v40 = vld [vmem:[%s6557_s4] sm:$0xff] }
   0xd   :  { %3699 = vmatprep.mubr.msk.f32.mxu1 %vm585_vm0, %v567_v12  ;;  %v580_v38 = vld [vmem:[%s6555_s0 + $0x78] sm:$0xff]  ;;  %v780_v41 = vld [vmem:[%s6557_s4 + $0x8] sm:$0xf]  ;;  %vm5238_vm3 = vmpackc.low %vm837_vm1, %vm4991_vm2 }
   0xe   :  { %v4264_v42 = vpack.c.bf16 %v780_v41, %v779_v40  ;;  %v549_v44 = vld [vmem:[%s6558_s1] sm:$0xff]  ;;  %v550_v45 = vld [vmem:[%s6558_s1 + $0x8] sm:$0xff]  ;;  %v551_v46 = vld [vmem:[%s6558_s1 + $0x10] sm:$0xff] }
   0xf   :  { %72 = vperm.xlu1 %4710, %v5130_v21   ;;  %v552_v47 = vld [vmem:[%s6558_s1 + $0x18] sm:$0xff]  ;;  %v553_v48 = vld [vmem:[%s6558_s1 + $0x20] sm:$0xff]  ;;  %v554_v49 = vld [vmem:[%s6558_s1 + $0x28] sm:$0xff] }
  0x10   :  { %3700 = vmatmul.mubr.msk.f32.gmra.mrb[2].mxu1 %vm585_vm0, %v568_v14  ;;  %69 = vperm.xlu0 %4709, %v5122_v19   ;;  %v555_v50 = vld [vmem:[%s6558_s1 + $0x30] sm:$0xff]  ;;  %v556_v51 = vld [vmem:[%s6558_s1 + $0x38] sm:$0xff]  ;;  %v557_v52 = vld [vmem:[%s6558_s1 + $0x40] sm:$0xff] }
  0x11   :  { %3702 = vmatprep.mubr.msk.f32.mxu1 %vm585_vm0, %v569_v16  ;;  %4266 = vmatprep.subr.msk.bf16.mxu1 %vm5238_vm3, %v4264_v42  ;;  %v558_v53 = vld [vmem:[%s6558_s1 + $0x48] sm:$0xff]  ;;  %v559_v54 = vld [vmem:[%s6558_s1 + $0x50] sm:$0xff]  ;;  %v560_v55 = vld [vmem:[%s6558_s1 + $0x58] sm:$0xff] }
  0x12   :  { %4269 = vmatpush3.bf16.msk.msra.mxu1 %vm5238_vm3, %v4264_v42  ;;  %v561_v56 = vld [vmem:[%s6558_s1 + $0x60] sm:$0xff]  ;;  %v562_v57 = vld [vmem:[%s6558_s1 + $0x68] sm:$0xff]  ;;  %v563_v59 = vld [vmem:[%s6558_s1 + $0x70] sm:$0xff] }
  0x13   :  { %75 = vperm.xlu1 %4710, %v5150_v25   ;;  %v564_v60 = vld [vmem:[%s6558_s1 + $0x78] sm:$0xff]  ;;  %v4961_v43 = vld [vmem:[%s6555_s0 + $0x20] sm:$0xff] }
  0x14   :  { %3703 = vmatmul.mubr.msk.f32.gmra.mrb[4].mxu1 %vm585_vm0, %v570_v18  ;;  %78 = vperm.xlu0 %4709, %v5142_v23  }
  0x15   :  { %3705 = vmatprep.mubr.msk.f32.mxu1 %vm585_vm0, %v571_v20 }
  0x17   :  { %84 = vperm.xlu1 %4710, %v5170_v29  }
  0x18   :  { %3706 = vmatmul.mubr.msk.f32.gmra.mrb[6].mxu1 %vm585_vm0, %v572_v22  ;;  %81 = vperm.xlu0 %4709, %v5162_v27  }
  0x19   :  { %3708 = vmatprep.mubr.msk.f32.mxu1 %vm585_vm0, %v573_v24 }
  0x1b   :  { %87 = vperm.xlu1 %4710, %v5190_v33  }
  0x1c   :  { %3709 = vmatmul.mubr.msk.f32.gmra.mrb[8].mxu1 %vm585_vm0, %v574_v26  ;;  %90 = vperm.xlu0 %4709, %v5182_v31  }
  0x1d   :  { %3711 = vmatprep.mubr.msk.f32.mxu1 %vm585_vm0, %v575_v28 }
  0x1f   :  { %96 = vperm.xlu1 %4710, %v5210_v37  }
  0x20   :  { %3712 = vmatmul.mubr.msk.f32.gmra.mrb[10].mxu1 %vm585_vm0, %v576_v30  ;;  %93 = vperm.xlu0 %4709, %v5202_v35  }
  0x21   :  { %3714 = vmatprep.mubr.msk.f32.mxu1 %vm585_vm0, %v577_v32 }
  0x23   :  { %4711 = vset.pattern.permute.xlu1 %v4990_v39 }
  0x24   :  { %3715 = vmatmul.mubr.msk.f32.gmra.mrb[12].mxu1 %vm585_vm0, %v578_v34  ;;  %4712 = vset.pattern.permute.xlu0 %v4990_v39 }
  0x25   :  { %3717 = vmatprep.mubr.msk.f32.mxu1 %vm585_vm0, %v579_v36  ;;  %182 = vperm.xlu0 %4712, %v5082_v11  }
  0x26   :  { %179 = vperm.xlu1 %4711, %v5067_v8  }
  0x28   :  { %3718 = vmatmul.mubr.msk.f32.gmra.mrb[14].mxu1 %vm585_vm0, %v580_v38 }
  0x29   :  { %188 = vperm.xlu0 %4712, %v5090_v13   ;;  %3724 = vmatprep.mubr.msk.f32.mxu1 %vm788_vm4, %v549_v44 }
  0x2a   :  { %185 = vperm.xlu1 %4711, %v5073_v9  }
  0x2c   :  { %3725 = vmatmul.mubr.msk.f32.vlgmr.msra.gmra.mrb[16].mxu1 %vm788_vm4, %v550_v45 }
  0x2d   :  { %191 = vperm.xlu0 %4712, %v5110_v17   ;;  %3727 = vmatprep.mubr.msk.f32.mxu1 %vm788_vm4, %v551_v46 }
  0x2e   :  { %194 = vperm.xlu1 %4711, %v5102_v15  }
  0x30   :  { %3728 = vmatmul.mubr.msk.f32.gmra.mrb[18].mxu1 %vm788_vm4, %v552_v47 }
  0x31   :  { %200 = vperm.xlu0 %4712, %v5130_v21   ;;  %3730 = vmatprep.mubr.msk.f32.mxu1 %vm788_vm4, %v553_v48 }
  0x32   :  { %197 = vperm.xlu1 %4711, %v5122_v19  }
  0x34   :  { %3731 = vmatmul.mubr.msk.f32.gmra.mrb[20].mxu1 %vm788_vm4, %v554_v49 }
  0x35   :  { %203 = vperm.xlu0 %4712, %v5150_v25   ;;  %3733 = vmatprep.mubr.msk.f32.mxu1 %vm788_vm4, %v555_v50 }
  0x36   :  { %206 = vperm.xlu1 %4711, %v5142_v23  }
  0x38   :  { %3734 = vmatmul.mubr.msk.f32.gmra.mrb[22].mxu1 %vm788_vm4, %v556_v51 }
  0x39   :  { %212 = vperm.xlu0 %4712, %v5170_v29   ;;  %3736 = vmatprep.mubr.msk.f32.mxu1 %vm788_vm4, %v557_v52 }
  0x3a   :  { %209 = vperm.xlu1 %4711, %v5162_v27  }
  0x3c   :  { %3737 = vmatmul.mubr.msk.f32.gmra.mrb[24].mxu1 %vm788_vm4, %v558_v53 }
  0x3d   :  { %3739 = vmatprep.mubr.msk.f32.mxu1 %vm788_vm4, %v559_v54 }
  0x40   :  { %3740 = vmatmul.mubr.msk.f32.gmra.mrb[26].mxu1 %vm788_vm4, %v560_v55 }
  0x41   :  { %3742 = vmatprep.mubr.msk.f32.mxu1 %vm788_vm4, %v561_v56 }
  0x44   :  { %3743 = vmatmul.mubr.msk.f32.gmra.mrb[28].mxu1 %vm788_vm4, %v562_v57  ;;  %v4995_v57 = vmov 2  }
  0x45   :  { %3745 = vmatprep.mubr.msk.f32.mxu1 %vm788_vm4, %v563_v59 }
  0x48   :  { %3746 = vmatmul.mubr.msk.f32.gmra.mrb[30].mxu1 %vm788_vm4, %v564_v60 }
  0x82   :  { %v5344_v30 = vpop.permute.xlu1 %57 }
  0x83   :  { %v5311_v62 = vpop.permute.xlu0 %51  ;;  %vm100_vm7 = vcmp.eq.s32.totalorder %v5309_v61, %v5344_v30 }
  0x84   :  { %vm98_vm5 = vcmp.eq.s32.totalorder %v5309_v61, %v5311_v62 }
  0x85   :  { %3780 = vmatprep.mubr.msk.f32.mxu1 %vm98_vm5, %v6623_v63 }
  0x86   :  { %v5356_v42 = vpop.permute.xlu1 %60 }
  0x87   :  { %v5354_v41 = vpop.permute.xlu0 %54  ;;  %vm101_vm8 = vcmp.eq.s32.totalorder %v5309_v61, %v5356_v42 }
  0x88   :  { %vm99_vm6 = vcmp.eq.s32.totalorder %v5309_v61, %v5354_v41 }
  0x8a   :  { %v5368_v51 = vpop.permute.xlu1 %63 }
  0x8b   :  { %v5363_v48 = vpop.permute.xlu0 %66  ;;  %vm102_vm9 = vcmp.eq.s32.totalorder %v5309_v61, %v5368_v51 }
  0x8c   :  { %vm103_vm10 = vcmp.eq.s32.totalorder %v5309_v61, %v5363_v48 }
  0x8e   :  { %v5382_v55 = vpop.permute.xlu1 %72 }
  0x8f   :  { %v5376_v54 = vpop.permute.xlu0 %69  ;;  %vm105_vm12 = vcmp.eq.s32.totalorder %v5309_v61, %v5382_v55 }
  0x90   :  { %vm104_vm11 = vcmp.eq.s32.totalorder %v5309_v61, %v5376_v54 }
  0x92   :  { %v5403_v58 = vpop.permute.xlu1 %75 }
  0x93   :  { %v5396_v56 = vpop.permute.xlu0 %78  ;;  %vm106_vm13 = vcmp.eq.s32.totalorder %v5309_v61, %v5403_v58 }
  0x94   :  { %vm6564_vm14 = vcmp.eq.s32.totalorder %v5309_v61, %v5396_v56 }
  0x96   :  { %v5431_v60 = vpop.permute.xlu1 %84 }
  0x97   :  { %v5419_v59 = vpop.permute.xlu0 %81  ;;  %vm6566_vm1 = vcmp.eq.s32.totalorder %v5309_v61, %v5431_v60 }
  0x98   :  { %vm6565_vm15 = vcmp.eq.s32.totalorder %v5309_v61, %v5419_v59 }
  0xdf   :  { %v3698_v0 = vpop.f32.mrb[0].mxu1 }
  0xe0   :  { %v700_v1 = vpop.f32.mrb[1].mxu1 }
  0xe1   :  { %v5320_v2 = vpack.i.bf16 %v3698_v0, %v700_v1  ;;  %v4270_v3 = vpack.c.bf16 %v3698_v0, %v700_v1  ;;  %v5448_v0 = vpop.permute.xlu0 %90  ;;  %v5454_v1 = vpop.permute.xlu1 %87 }
  0xe2   :  { %vm6567_vm2 = vcmp.eq.s32.totalorder %v5309_v61, %v5454_v1 }
  0xe3   :  { %4719 = vrot.lane.b32.xlu1 %v5320_v2, %s4993_s24  ;;  %4714 = vrot.lane.b32.xlu0 %v5320_v2, %s4994_s25  ;;  %v3701_v4 = vpop.f32.mrb[2].mxu1 }
  0xe4   :  { %4271 = vmatprep.subr.bf16.mxu1 %v4270_v3  ;;  %v710_v5 = vpop.f32.mrb[3].mxu1 }
  0xe5   :  { %4273 = vmatpush3.bf16.msra.mxu1 %v4270_v3  ;;  %v5326_v6 = vpack.i.bf16 %v3701_v4, %v710_v5  ;;  %v4274_v7 = vpack.c.bf16 %v3701_v4, %v710_v5  ;;  %v5483_v3 = vpop.permute.xlu1 %96 }
  0xe7   :  { %4729 = vrot.lane.b32.xlu0 %v5326_v6, %s4993_s24  ;;  %4724 = vrot.lane.b32.xlu1 %v5326_v6, %s4994_s25  ;;  %v3704_v10 = vpop.f32.mrb[4].mxu1 }
  0xe8   :  { %4275 = vmatprep.subr.bf16.mxu1 %v4274_v7  ;;  %v720_v12 = vpop.f32.mrb[5].mxu1 }
  0xe9   :  { %4277 = vmatpush3.bf16.msra.mxu1 %v4274_v7  ;;  %v5332_v14 = vpack.i.bf16 %v3704_v10, %v720_v12  ;;  %v4278_v16 = vpack.c.bf16 %v3704_v10, %v720_v12  ;;  %v5500_v4 = vpop.permute.xlu1 %179 }
  0xeb   :  { %4739 = vrot.lane.b32.xlu1 %v5332_v14, %s4993_s24  ;;  %4734 = vrot.lane.b32.xlu0 %v5332_v14, %s4994_s25  ;;  %v3707_v18 = vpop.f32.mrb[6].mxu1 }
  0xec   :  { %4279 = vmatprep.subr.bf16.mxu1 %v4278_v16  ;;  %v730_v20 = vpop.f32.mrb[7].mxu1 }
  0xed   :  { %4281 = vmatpush3.bf16.msra.mxu1 %v4278_v16  ;;  %v5338_v22 = vpack.i.bf16 %v3707_v18, %v730_v20  ;;  %v4282_v24 = vpack.c.bf16 %v3707_v18, %v730_v20  ;;  %v5533_v7 = vpop.permute.xlu1 %185 }
  0xef   :  { %4749 = vrot.lane.b32.xlu0 %v5338_v22, %s4993_s24  ;;  %4744 = vrot.lane.b32.xlu1 %v5338_v22, %s4994_s25  ;;  %v3710_v26 = vpop.f32.mrb[8].mxu1 }
  0xf0   :  { %4283 = vmatprep.subr.bf16.mxu1 %v4282_v24  ;;  %v740_v28 = vpop.f32.mrb[9].mxu1 }
  0xf1   :  { %4285 = vmatpush3.bf16.msra.mxu1 %v4282_v24  ;;  %v5346_v32 = vpack.i.bf16 %v3710_v26, %v740_v28  ;;  %v4286_v34 = vpack.c.bf16 %v3710_v26, %v740_v28  ;;  %v5539_v12 = vpop.permute.xlu1 %194 }
  0xf3   :  { %4759 = vrot.lane.b32.xlu1 %v5346_v32, %s4993_s24  ;;  %4754 = vrot.lane.b32.xlu0 %v5346_v32, %s4994_s25  ;;  %v3713_v36 = vpop.f32.mrb[10].mxu1 }
  0xf4   :  { %4287 = vmatprep.subr.bf16.mxu1 %v4286_v34  ;;  %v750_v38 = vpop.f32.mrb[11].mxu1 }
  0xf5   :  { %4289 = vmatpush3.bf16.msra.mxu1 %v4286_v34  ;;  %v5352_v39 = vpack.i.bf16 %v3713_v36, %v750_v38  ;;  %v4290_v40 = vpack.c.bf16 %v3713_v36, %v750_v38 }
  0xf7   :  { %215 = vperm.xlu0 %4712, %v5190_v33   ;;  %4764 = vrot.lane.b32.xlu1 %v5352_v39, %s4994_s25  ;;  %v3716_v44 = vpop.f32.mrb[12].mxu1 }
  0xf8   :  { %4291 = vmatprep.subr.bf16.mxu1 %v4290_v40  ;;  %v760_v45 = vpop.f32.mrb[13].mxu1 }
  0xf9   :  { %4293 = vmatpush3.bf16.msra.mxu1 %v4290_v40  ;;  %v5361_v46 = vpack.i.bf16 %v3716_v44, %v760_v45  ;;  %v4294_v47 = vpack.c.bf16 %v3716_v44, %v760_v45 }
  0xfb   :  { %218 = vperm.xlu1 %4711, %v5182_v31   ;;  %4769 = vrot.lane.b32.xlu0 %v5361_v46, %s4994_s25  ;;  %v3719_v49 = vpop.f32.mrb[14].mxu1 }
  0xfc   :  { %4295 = vmatprep.subr.bf16.mxu1 %v4294_v47  ;;  %v770_v50 = vpop.f32.mrb[15].mxu1 }
  0xfd   :  { %4297 = vmatpush3.bf16.msra.mxu1 %v4294_v47  ;;  %v5370_v52 = vpack.i.bf16 %v3719_v49, %v770_v50  ;;  %v4298_v53 = vpack.c.bf16 %v3719_v49, %v770_v50 }
  0xff   :  { %4774 = vrot.lane.b32.xlu0 %v5352_v39, %s4993_s24  ;;  %4779 = vrot.lane.b32.xlu1 %v5370_v52, %s4994_s25 }
 0x100   :  { %4299 = vmatprep.subr.bf16.mxu1 %v4298_v53 }
 0x101   :  { %4301 = vmatpush3.bf16.msra.mxu1 %v4298_v53 }
 0x103   :  { %224 = vperm.xlu0 %4712, %v5210_v37   ;;  %221 = vperm.xlu1 %4711, %v5202_v35  }
 0x104   :  { %3781 = vmatmul.mubr.msk.f32.vlgmr.msra.gmra.mrb[16].mxu1 %vm99_vm6, %v6623_v63 }
 0x105   :  { %3783 = vmatprep.mubr.msk.f32.mxu1 %vm100_vm7, %v6623_v63 }
 0x107   :  { %4788 = vset.pattern.permute.xlu0 %v4995_v57  ;;  %4784 = vrot.lane.b32.xlu1 %v5361_v46, %s4993_s24 }
 0x108   :  { %308 = vperm.xlu0 %4788, %v5067_v8   ;;  %4789 = vset.pattern.permute.xlu1 %v4995_v57 }
 0x109   :  { %3784 = vmatmul.mubr.msk.f32.gmra.mrb[18].mxu1 %vm101_vm8, %v6623_v63 }
 0x10a   :  { %3786 = vmatprep.mubr.msk.f32.mxu1 %vm102_vm9, %v6623_v63 }
 0x10b   :  { %311 = vperm.xlu1 %4789, %v5082_v11  }
 0x10c   :  { %314 = vperm.xlu0 %4788, %v5073_v9  }
 0x10d   :  { %3787 = vmatmul.mubr.msk.f32.gmra.mrb[20].mxu1 %vm103_vm10, %v6623_v63 }
 0x10e   :  { %3789 = vmatprep.mubr.msk.f32.mxu1 %vm104_vm11, %v6623_v63 }
 0x10f   :  { %317 = vperm.xlu1 %4789, %v5090_v13  }
 0x110   :  { %4791 = vrot.lane.b32.xlu0 %v5320_v2, %s4996_s26  ;;  %v5471_v2 = vpop.permute.xlu0 %93 }
 0x111   :  { %3790 = vmatmul.mubr.msk.f32.gmra.mrb[22].mxu1 %vm105_vm12, %v6623_v63 }
 0x112   :  { %3792 = vmatprep.mubr.msk.f32.mxu1 %vm106_vm13, %v6623_v63 }
 0x113   :  { %320 = vperm.xlu1 %4789, %v5110_v17  }
 0x114   :  { %323 = vperm.xlu0 %4788, %v5102_v15   ;;  %v5527_v5 = vpop.permute.xlu0 %182 }
 0x115   :  { %3793 = vmatmul.mubr.msk.f32.gmra.mrb[24].mxu1 %vm6564_vm14, %v6623_v63  ;;  %vm6571_vm14 = vcmp.eq.s32.totalorder %v5309_v61, %v5448_v0 }
 0x116   :  { %3795 = vmatprep.mubr.msk.f32.mxu1 %vm6565_vm15, %v6623_v63  ;;  %vm6570_vm15 = vcmp.eq.s32.totalorder %v5309_v61, %v5471_v2 }
 0x117   :  { %4796 = vrot.lane.b32.xlu1 %v5326_v6, %s4996_s26  ;;  %v4997_v6 = vmov 3  }
 0x118   :  { %326 = vperm.xlu0 %4788, %v5122_v19   ;;  %v5535_v10 = vpop.permute.xlu0 %188 }
 0x119   :  { %3796 = vmatmul.mubr.msk.f32.gmra.mrb[26].mxu1 %vm6566_vm1, %v6623_v63  ;;  %vm6569_vm1 = vcmp.eq.s32.totalorder %v5309_v61, %v5483_v3 }
 0x11a   :  { %3798 = vmatprep.mubr.msk.f32.mxu1 %vm6567_vm2, %v6623_v63  ;;  %vm6568_vm2 = vcmp.eq.s32.totalorder %v5309_v61, %v5500_v4 }
 0x11b   :  { %329 = vperm.xlu1 %4789, %v5130_v21  }
 0x11c   :  { %4801 = vrot.lane.b32.xlu0 %v5332_v14, %s4996_s26  ;;  %v5541_v14 = vpop.permute.xlu0 %191 }
 0x11d   :  { %3799 = vmatmul.mubr.msk.f32.gmra.mrb[28].mxu1 %vm6571_vm14, %v6623_v63  ;;  %vm6574_vm14 = vcmp.eq.s32.totalorder %v5309_v61, %v5541_v14 }
 0x11e   :  { %3801 = vmatprep.mubr.msk.f32.mxu1 %vm6570_vm15, %v6623_v63  ;;  %vm6575_vm15 = vcmp.eq.s32.totalorder %v5309_v61, %v5535_v10 }
 0x11f   :  { %4806 = vrot.lane.b32.xlu1 %v5370_v52, %s4993_s24 }
 0x120   :  { %335 = vperm.xlu0 %4788, %v5142_v23   ;;  %v5550_v16 = vpop.permute.xlu0 %200 }
 0x121   :  { %3802 = vmatmul.mubr.msk.f32.gmra.mrb[30].mxu1 %vm6569_vm1, %v6623_v63  ;;  %vm6572_vm1 = vcmp.eq.s32.totalorder %v5309_v61, %v5533_v7 }
 0x122   :  { %3836 = vmatprep.mubr.msk.f32.mxu1 %vm6568_vm2, %v6623_v63  ;;  %vm6573_vm2 = vcmp.eq.s32.totalorder %v5309_v61, %v5527_v5 }
 0x123   :  { %332 = vperm.xlu1 %4789, %v5150_v25  }
 0x124   :  { %338 = vperm.xlu0 %4788, %v5162_v27  }
 0x127   :  { %4811 = vrot.lane.b32.xlu1 %v5338_v22, %s4996_s26 }
 0x128   :  { %4816 = vrot.lane.b32.xlu0 %v5346_v32, %s4996_s26 }
 0x12b   :  { %341 = vperm.xlu1 %4789, %v5170_v29  }
 0x12c   :  { %347 = vperm.xlu0 %4788, %v5182_v31  }
 0x12f   :  { %344 = vperm.xlu1 %4789, %v5190_v33  }
 0x130   :  { %350 = vperm.xlu0 %4788, %v5202_v35  }
 0x133   :  { %4821 = vrot.lane.b32.xlu1 %v5352_v39, %s4996_s26 }
 0x134   :  { %4826 = vrot.lane.b32.xlu0 %v5361_v46, %s4996_s26 }
 0x135   :  { %4831 = vset.pattern.permute.xlu0 %v4997_v6 }
 0x137   :  { %353 = vperm.xlu1 %4789, %v5210_v37  }
 0x138   :  { %440 = vperm.xlu0 %4831, %v5082_v11   ;;  %v5548_v11 = vpop.permute.xlu1 %197 }
 0x13b   :  { %4830 = vset.pattern.permute.xlu1 %v4997_v6 }
 0x13c   :  { %446 = vperm.xlu0 %4831, %v5090_v13   ;;  %437 = vperm.xlu1 %4830, %v5067_v8   ;;  %v5554_v8 = vpop.permute.xlu1 %206  ;;  %v5556_v13 = vpop.permute.xlu0 %203 }
 0x140   :  { %452 = vperm.xlu0 %4831, %v5102_v15   ;;  %4833 = vrot.lane.b32.xlu1 %v5370_v52, %s4996_s26  ;;  %v5564_v15 = vpop.permute.xlu0 %212 }
 0x144   :  { %458 = vperm.xlu0 %4831, %v5130_v21   ;;  %443 = vperm.xlu1 %4830, %v5073_v9   ;;  %v5562_v9 = vpop.permute.xlu1 %209 }
 0x148   :  { %464 = vperm.xlu0 %4831, %v5142_v23   ;;  %449 = vperm.xlu1 %4830, %v5110_v17  }
 0x14c   :  { %470 = vperm.xlu0 %4831, %v5170_v29   ;;  %455 = vperm.xlu1 %4830, %v5122_v19  }
 0x150   :  { %476 = vperm.xlu0 %4831, %v5182_v31   ;;  %461 = vperm.xlu1 %4830, %v5150_v25  }
 0x154   :  { %482 = vperm.xlu0 %4831, %v5210_v37   ;;  %467 = vperm.xlu1 %4830, %v5162_v27  }
 0x155   :  { %v4720_v17 = vpop.permute.xlu1 %4719  ;;  %v4715_v21 = vpop.permute.xlu0 %4714 }
 0x156   :  { %v4717_v23 = vunpack.i.h.bf16 %v4715_v21  ;;  %v4716_v18 = vunpack.i.l.bf16 %v4715_v21 }
 0x158   :  { %v4302_v20 = vpack.c.bf16 %v4717_v23, %v4716_v18  ;;  %473 = vperm.xlu1 %4830, %v5190_v33  }
 0x159   :  { %v5569_v19 = vpop.permute.xlu0 %4729  ;;  %v4725_v29 = vpop.permute.xlu1 %4724 }
 0x15a   :  { %v4727_v31 = vunpack.i.h.bf16 %v4725_v29  ;;  %v4726_v25 = vunpack.i.l.bf16 %v4725_v29  ;;  %4303 = vmatprep.subr.bf16.mxu1 %v4302_v20  ;;  %v4722_v29 = vunpack.i.h.bf16 %v4720_v17 }
 0x15b   :  { %4305 = vmatpush3.bf16.msra.mxu1 %v4302_v20 }
 0x15c   :  { %v4306_v22 = vpack.c.bf16 %v4727_v31, %v4726_v25  ;;  %479 = vperm.xlu1 %4830, %v5202_v35   ;;  %v4721_v31 = vunpack.i.l.bf16 %v4720_v17 }
 0x15d   :  { %v5572_v37 = vpop.permute.xlu1 %4739  ;;  %v4735_v27 = vpop.permute.xlu0 %4734 }
 0x15e   :  { %v4737_v24 = vunpack.i.h.bf16 %v4735_v27  ;;  %v4736_v26 = vunpack.i.l.bf16 %v4735_v27  ;;  %4307 = vmatprep.subr.bf16.mxu1 %v4306_v22 }
 0x15f   :  { %4309 = vmatpush3.bf16.msra.mxu1 %v4306_v22 }
 0x160   :  { %v4310_v28 = vpack.c.bf16 %v4737_v24, %v4736_v26 }
 0x161   :  { %v5574_v32 = vpop.permute.xlu0 %4749  ;;  %v4745_v33 = vpop.permute.xlu1 %4744 }
 0x162   :  { %v4747_v34 = vunpack.i.h.bf16 %v4745_v33  ;;  %v4746_v36 = vunpack.i.l.bf16 %v4745_v33  ;;  %4311 = vmatprep.subr.bf16.mxu1 %v4310_v28  ;;  %v4732_v33 = vunpack.i.h.bf16 %v5569_v19 }
 0x163   :  { %4313 = vmatpush3.bf16.msra.mxu1 %v4310_v28  ;;  %v4334_v28 = vpack.c.bf16 %v4722_v29, %v4721_v31 }
 0x164   :  { %v4314_v38 = vpack.c.bf16 %v4747_v34, %v4746_v36  ;;  %v4731_v34 = vunpack.i.l.bf16 %v5569_v19 }
 0x165   :  { %v5576_v39 = vpop.permute.xlu1 %4759  ;;  %v4755_v40 = vpop.permute.xlu0 %4754 }
 0x166   :  { %v4757_v35 = vunpack.i.h.bf16 %v4755_v40  ;;  %v4756_v44 = vunpack.i.l.bf16 %v4755_v40  ;;  %4315 = vmatprep.subr.bf16.mxu1 %v4314_v38  ;;  %v4338_v36 = vpack.c.bf16 %v4732_v33, %v4731_v34  ;;  %v4741_v40 = vunpack.i.l.bf16 %v5572_v37 }
 0x167   :  { %4317 = vmatpush3.bf16.msra.mxu1 %v4314_v38  ;;  %v4742_v38 = vunpack.i.h.bf16 %v5572_v37 }
 0x168   :  { %v4318_v45 = vpack.c.bf16 %v4757_v35, %v4756_v44  ;;  %v4752_v44 = vunpack.i.h.bf16 %v5574_v32 }
 0x169   :  { %v4765_v46 = vpop.permute.xlu1 %4764  ;;  %v4342_v37 = vpack.c.bf16 %v4742_v38, %v4741_v40 }
 0x16a   :  { %v4767_v47 = vunpack.i.h.bf16 %v4765_v46  ;;  %v4766_v49 = vunpack.i.l.bf16 %v4765_v46  ;;  %4319 = vmatprep.subr.bf16.mxu1 %v4318_v45 }
 0x16b   :  { %4321 = vmatpush3.bf16.msra.mxu1 %v4318_v45  ;;  %v4751_v45 = vunpack.i.l.bf16 %v5574_v32 }
 0x16c   :  { %v4322_v50 = vpack.c.bf16 %v4767_v47, %v4766_v49  ;;  %v4762_v49 = vunpack.i.h.bf16 %v5576_v39 }
 0x16d   :  { %v4346_v32 = vpack.c.bf16 %v4752_v44, %v4751_v45 }
 0x16e   :  { %4323 = vmatprep.subr.bf16.mxu1 %v4322_v50 }
 0x16f   :  { %4325 = vmatpush3.bf16.msra.mxu1 %v4322_v50  ;;  %v4761_v50 = vunpack.i.l.bf16 %v5576_v39 }
 0x171   :  { %v4350_v39 = vpack.c.bf16 %v4762_v49, %v4761_v50 }
 0x176   :  { %v5578_v52 = vpop.permute.xlu0 %215 }
 0x17a   :  { %v5580_v53 = vpop.permute.xlu1 %218  ;;  %v4770_v57 = vpop.permute.xlu0 %4769 }
 0x17b   :  { %v4772_v6 = vunpack.i.h.bf16 %v4770_v57  ;;  %v4771_v21 = vunpack.i.l.bf16 %v4770_v57 }
 0x17d   :  { %v4326_v23 = vpack.c.bf16 %v4772_v6, %v4771_v21 }
 0x17e   :  { %v5582_v18 = vpop.permute.xlu0 %4774  ;;  %v4780_v20 = vpop.permute.xlu1 %4779 }
 0x17f   :  { %v4782_v25 = vunpack.i.h.bf16 %v4780_v20  ;;  %v4781_v22 = vunpack.i.l.bf16 %v4780_v20  ;;  %4327 = vmatprep.subr.bf16.mxu1 %v4326_v23  ;;  %v4777_v21 = vunpack.i.h.bf16 %v5582_v18 }
 0x180   :  { %4329 = vmatpush3.bf16.msra.mxu1 %v4326_v23  ;;  %v4776_v23 = vunpack.i.l.bf16 %v5582_v18 }
 0x181   :  { %v4330_v27 = vpack.c.bf16 %v4782_v25, %v4781_v22 }
 0x182   :  { %v5584_v24 = vpop.permute.xlu0 %224  ;;  %v5586_v26 = vpop.permute.xlu1 %221  ;;  %v4354_v18 = vpack.c.bf16 %v4777_v21, %v4776_v23 }
 0x183   :  { %4331 = vmatprep.subr.bf16.mxu1 %v4330_v27 }
 0x184   :  { %4333 = vmatpush3.bf16.msra.mxu1 %v4330_v27 }
 0x185   :  { %4335 = vmatprep.subr.bf16.mxu1 %v4334_v28 }
 0x186   :  { %v4785_v17 = vpop.permute.xlu1 %4784 }
 0x187   :  { %v5596_v35 = vpop.permute.xlu0 %308  ;;  %3837 = vmatmul.mubr.msk.f32.vlgmr.msra.gmra.mrb[16].mxu1 %vm6573_vm2, %v6623_v63  ;;  %vm6576_vm2 = vcmp.eq.s32.totalorder %v5309_v61, %v5548_v11  ;;  %v4787_v31 = vunpack.i.h.bf16 %v4785_v17  ;;  %v4786_v25 = vunpack.i.l.bf16 %v4785_v17 }
 0x188   :  { %3839 = vmatprep.mubr.msk.f32.mxu1 %vm6572_vm1, %v6623_v63  ;;  %4337 = vmatpush3.bf16.msra.mxu1 %v4334_v28  ;;  %vm6577_vm1 = vcmp.eq.s32.totalorder %v5309_v61, %v5539_v12 }
 0x189   :  { %4339 = vmatprep.subr.bf16.mxu1 %v4338_v36  ;;  %v4358_v28 = vpack.c.bf16 %v4787_v31, %v4786_v25 }
 0x18a   :  { %v5608_v19 = vpop.permute.xlu1 %311 }
 0x18b   :  { %v5614_v46 = vpop.permute.xlu0 %314  ;;  %3840 = vmatmul.mubr.msk.f32.gmra.mrb[18].mxu1 %vm6575_vm15, %v6623_v63  ;;  %vm6578_vm15 = vcmp.eq.s32.totalorder %v5309_v61, %v5556_v13 }
 0x18c   :  { %3842 = vmatprep.mubr.msk.f32.mxu1 %vm6574_vm14, %v6623_v63  ;;  %4341 = vmatpush3.bf16.msra.mxu1 %v4338_v36  ;;  %vm6579_vm14 = vcmp.eq.s32.totalorder %v5309_v61, %v5550_v16 }
 0x18d   :  { %4343 = vmatprep.subr.bf16.mxu1 %v4342_v37 }
 0x18e   :  { %v5626_v47 = vpop.permute.xlu1 %317 }
 0x18f   :  { %v4792_v57 = vpop.permute.xlu0 %4791  ;;  %3843 = vmatmul.mubr.msk.f32.gmra.mrb[20].mxu1 %vm6577_vm1, %v6623_v63  ;;  %vm6580_vm1 = vcmp.eq.s32.totalorder %v5309_v61, %v5562_v9 }
 0x190   :  { %3845 = vmatprep.mubr.msk.f32.mxu1 %vm6576_vm2, %v6623_v63  ;;  %4345 = vmatpush3.bf16.msra.mxu1 %v4342_v37  ;;  %vm6581_vm2 = vcmp.eq.s32.totalorder %v5309_v61, %v5554_v8  ;;  %v4794_v17 = vunpack.i.h.bf16 %v4792_v57  ;;  %v4793_v36 = vunpack.i.l.bf16 %v4792_v57 }
 0x191   :  { %4347 = vmatprep.subr.bf16.mxu1 %v4346_v32 }
 0x192   :  { %v5642_v6 = vpop.permute.xlu1 %320 }
 0x193   :  { %v5648_v20 = vpop.permute.xlu0 %323  ;;  %3846 = vmatmul.mubr.msk.f32.gmra.mrb[22].mxu1 %vm6579_vm14, %v6623_v63  ;;  %vm6582_vm14 = vcmp.eq.s32.totalorder %v5309_v61, %v5578_v52 }
 0x194   :  { %3848 = vmatprep.mubr.msk.f32.mxu1 %vm6578_vm15, %v6623_v63  ;;  %4349 = vmatpush3.bf16.msra.mxu1 %v4346_v32  ;;  %vm6583_vm15 = vcmp.eq.s32.totalorder %v5309_v61, %v5564_v15  ;;  %v4366_v32 = vpack.c.bf16 %v4794_v17, %v4793_v36 }
 0x195   :  { %4351 = vmatprep.subr.bf16.mxu1 %v4350_v39 }
 0x196   :  { %v4797_v29 = vpop.permute.xlu1 %4796 }
 0x197   :  { %v5662_v22 = vpop.permute.xlu0 %326  ;;  %3849 = vmatmul.mubr.msk.f32.gmra.mrb[24].mxu1 %vm6581_vm2, %v6623_v63  ;;  %vm6584_vm2 = vcmp.eq.s32.totalorder %v5309_v61, %v5586_v26  ;;  %v4799_v49 = vunpack.i.h.bf16 %v4797_v29  ;;  %v4798_v50 = vunpack.i.l.bf16 %v4797_v29 }
 0x198   :  { %3851 = vmatprep.mubr.msk.f32.mxu1 %vm6580_vm1, %v6623_v63  ;;  %4353 = vmatpush3.bf16.msra.mxu1 %v4350_v39  ;;  %vm6585_vm1 = vcmp.eq.s32.totalorder %v5309_v61, %v5580_v53 }
 0x199   :  { %4355 = vmatprep.subr.bf16.mxu1 %v4354_v18  ;;  %v4370_v21 = vpack.c.bf16 %v4799_v49, %v4798_v50 }
 0x19a   :  { %v5674_v27 = vpop.permute.xlu1 %329 }
 0x19b   :  { %v4802_v33 = vpop.permute.xlu0 %4801  ;;  %3852 = vmatmul.mubr.msk.f32.gmra.mrb[26].mxu1 %vm6583_vm15, %v6623_v63  ;;  %vm6586_vm15 = vcmp.eq.s32.totalorder %v5309_v61, %v5596_v35 }
 0x19c   :  { %3854 = vmatprep.mubr.msk.f32.mxu1 %vm6582_vm14, %v6623_v63  ;;  %4357 = vmatpush3.bf16.msra.mxu1 %v4354_v18  ;;  %vm6587_vm14 = vcmp.eq.s32.totalorder %v5309_v61, %v5584_v24  ;;  %v4804_v23 = vunpack.i.h.bf16 %v4802_v33  ;;  %v4803_v29 = vunpack.i.l.bf16 %v4802_v33 }
 0x19d   :  { %4359 = vmatprep.subr.bf16.mxu1 %v4358_v28 }
 0x19e   :  { %v4807_v34 = vpop.permute.xlu1 %4806  ;;  %v4374_v25 = vpack.c.bf16 %v4804_v23, %v4803_v29 }
 0x19f   :  { %v4809_v38 = vunpack.i.h.bf16 %v4807_v34  ;;  %v4808_v40 = vunpack.i.l.bf16 %v4807_v34  ;;  %v5690_v37 = vpop.permute.xlu0 %335  ;;  %3855 = vmatmul.mubr.msk.f32.gmra.mrb[28].mxu1 %vm6585_vm1, %v6623_v63  ;;  %vm6588_vm1 = vcmp.eq.s32.totalorder %v5309_v61, %v5614_v46 }
 0x1a0   :  { %3857 = vmatprep.mubr.msk.f32.mxu1 %vm6584_vm2, %v6623_v63  ;;  %4361 = vmatpush3.bf16.msra.mxu1 %v4358_v28  ;;  %vm6589_vm2 = vcmp.eq.s32.totalorder %v5309_v61, %v5608_v19 }
 0x1a1   :  { %v4362_v44 = vpack.c.bf16 %v4809_v38, %v4808_v40 }
 0x1a2   :  { %v5702_v45 = vpop.permute.xlu1 %332 }
 0x1a3   :  { %v5706_v57 = vpop.permute.xlu0 %338  ;;  %3858 = vmatmul.mubr.msk.f32.gmra.mrb[30].mxu1 %vm6587_vm14, %v6623_v63  ;;  %4363 = vmatprep.subr.bf16.mxu1 %v4362_v44  ;;  %vm6590_vm14 = vcmp.eq.s32.totalorder %v5309_v61, %v5642_v6 }
 0x1a4   :  { %4365 = vmatpush3.bf16.msra.mxu1 %v4362_v44  ;;  %3892 = vmatprep.mubr.msk.f32.mxu1 %vm6586_vm15, %v6623_v63  ;;  %vm6591_vm15 = vcmp.eq.s32.totalorder %v5309_v61, %v5626_v47 }
 0x1a5   :  { %4367 = vmatprep.subr.bf16.mxu1 %v4366_v32 }
 0x1a6   :  { %v4812_v39 = vpop.permute.xlu1 %4811 }
 0x1a7   :  { %v4817_v18 = vpop.permute.xlu0 %4816  ;;  %3893 = vmatmul.mubr.msk.f32.vlgmr.msra.gmra.mrb[16].mxu1 %vm6589_vm2, %v6623_v63  ;;  %v4814_v28 = vunpack.i.h.bf16 %v4812_v39  ;;  %v4813_v33 = vunpack.i.l.bf16 %v4812_v39  ;;  %vm6592_vm2 = vcmp.eq.s32.totalorder %v5309_v61, %v5662_v22 }
 0x1a8   :  { %3895 = vmatprep.mubr.msk.f32.mxu1 %vm6588_vm1, %v6623_v63  ;;  %4369 = vmatpush3.bf16.msra.mxu1 %v4366_v32  ;;  %vm6593_vm1 = vcmp.eq.s32.totalorder %v5309_v61, %v5648_v20  ;;  %v4819_v38 = vunpack.i.h.bf16 %v4817_v18  ;;  %v4818_v40 = vunpack.i.l.bf16 %v4817_v18 }
 0x1a9   :  { %4371 = vmatprep.subr.bf16.mxu1 %v4370_v21  ;;  %v4378_v36 = vpack.c.bf16 %v4814_v28, %v4813_v33 }
 0x1aa   :  { %v5730_v31 = vpop.permute.xlu1 %341  ;;  %v4382_v49 = vpack.c.bf16 %v4819_v38, %v4818_v40 }
 0x1ab   :  { %v5734_v34 = vpop.permute.xlu0 %347  ;;  %3896 = vmatmul.mubr.msk.f32.gmra.mrb[18].mxu1 %vm6591_vm15, %v6623_v63  ;;  %vm6594_vm15 = vcmp.eq.s32.totalorder %v5309_v61, %v5702_v45 }
 0x1ac   :  { %6654 = vst [vmem:[#allocation3_spill] sm:$0xff] %v5734_v34  ;;  %3898 = vmatprep.mubr.msk.f32.mxu1 %vm6590_vm14, %v6623_v63  ;;  %4373 = vmatpush3.bf16.msra.mxu1 %v4370_v21  ;;  %vm6595_vm14 = vcmp.eq.s32.totalorder %v5309_v61, %v5674_v27 }
 0x1ad   :  { %4375 = vmatprep.subr.bf16.mxu1 %v4374_v25 }
 0x1ae   :  { %v5746_v17 = vpop.permute.xlu1 %344 }
 0x1af   :  { %v5750_v44 = vpop.permute.xlu0 %350  ;;  %3899 = vmatmul.mubr.msk.f32.gmra.mrb[20].mxu1 %vm6593_vm1, %v6623_v63  ;;  %vm6596_vm1 = vcmp.eq.s32.totalorder %v5309_v61, %v5706_v57 }
 0x1b0   :  { %6655 = vst [vmem:[#allocation4_spill] sm:$0xff] %v5750_v44  ;;  %3901 = vmatprep.mubr.msk.f32.mxu1 %vm6592_vm2, %v6623_v63  ;;  %4377 = vmatpush3.bf16.msra.mxu1 %v4374_v25  ;;  %vm6597_vm2 = vcmp.eq.s32.totalorder %v5309_v61, %v5690_v37 }
 0x1b1   :  { %4379 = vmatprep.subr.bf16.mxu1 %v4378_v36 }
 0x1b2   :  { %v4822_v32 = vpop.permute.xlu1 %4821 }
 0x1b3   :  { %v4824_v50 = vunpack.i.h.bf16 %v4822_v32  ;;  %v4823_v39 = vunpack.i.l.bf16 %v4822_v32  ;;  %v4827_v21 = vpop.permute.xlu0 %4826  ;;  %3902 = vmatmul.mubr.msk.f32.gmra.mrb[22].mxu1 %vm6595_vm14, %v6623_v63  ;;  %vm6598_vm14 = vcmp.eq.s32.totalorder %v5309_v61, %v5746_v17 }
 0x1b4   :  { %3904 = vmatprep.mubr.msk.f32.mxu1 %vm6594_vm15, %v6623_v63  ;;  %4381 = vmatpush3.bf16.msra.mxu1 %v4378_v36  ;;  %v4829_v18 = vunpack.i.h.bf16 %v4827_v21  ;;  %v4828_v25 = vunpack.i.l.bf16 %v4827_v21  ;;  %vm6599_vm15 = vcmp.eq.s32.totalorder %v5309_v61, %v5730_v31 }
 0x1b5   :  { %4383 = vmatprep.subr.bf16.mxu1 %v4382_v49  ;;  %v4386_v29 = vpack.c.bf16 %v4824_v50, %v4823_v39 }
 0x1b6   :  { %v5774_v23 = vpop.permute.xlu1 %353  ;;  %v4390_v33 = vpack.c.bf16 %v4829_v18, %v4828_v25 }
 0x1b7   :  { %6656 = vst [vmem:[#allocation5_spill] sm:$0xff] %v5774_v23  ;;  %v5778_v28 = vpop.permute.xlu0 %440  ;;  %3905 = vmatmul.mubr.msk.f32.gmra.mrb[24].mxu1 %vm6597_vm2, %v6623_v63  ;;  %vm6600_vm2 = vcmp.eq.s32.totalorder %v5309_v61, %v5750_v44 }
 0x1b8   :  { %6657 = vst [vmem:[#allocation6_spill] sm:$0xff] %v5778_v28  ;;  %3907 = vmatprep.mubr.msk.f32.mxu1 %vm6596_vm1, %v6623_v63  ;;  %4385 = vmatpush3.bf16.msra.mxu1 %v4382_v49  ;;  %vm6601_vm1 = vcmp.eq.s32.totalorder %v5309_v61, %v5734_v34 }
 0x1b9   :  { %4387 = vmatprep.subr.bf16.mxu1 %v4386_v29 }
 0x1bb   :  { %v5792_v36 = vpop.permute.xlu1 %437  ;;  %3908 = vmatmul.mubr.msk.f32.gmra.mrb[26].mxu1 %vm6599_vm15, %v6623_v63  ;;  %v5798_v38 = vpop.permute.xlu0 %446 }
 0x1bc   :  { %6658 = vst [vmem:[#allocation7_spill] sm:$0xff] %v5792_v36  ;;  %6659 = vst [vmem:[#allocation8_spill] sm:$0xff] %v5798_v38  ;;  %3910 = vmatprep.mubr.msk.f32.mxu1 %vm6598_vm14, %v6623_v63  ;;  %4389 = vmatpush3.bf16.msra.mxu1 %v4386_v29  ;;  %vm6603_vm14 = vcmp.eq.s32.totalorder %v5309_v61, %v5774_v23  ;;  %vm6602_vm15 = vcmp.eq.s32.totalorder %v5309_v61, %v5792_v36 }
 0x1bd   :  { %4391 = vmatprep.subr.bf16.mxu1 %v4390_v33 }
 0x1bf   :  { %v4834_v40 = vpop.permute.xlu1 %4833  ;;  %3911 = vmatmul.mubr.msk.f32.gmra.mrb[28].mxu1 %vm6601_vm1, %v6623_v63  ;;  %v5818_v50 = vpop.permute.xlu0 %452 }
 0x1c0   :  { %v4836_v32 = vunpack.i.h.bf16 %v4834_v40  ;;  %v4835_v49 = vunpack.i.l.bf16 %v4834_v40  ;;  %3913 = vmatprep.mubr.msk.f32.mxu1 %vm6600_vm2, %v6623_v63  ;;  %4393 = vmatpush3.bf16.msra.mxu1 %v4390_v33  ;;  %6660 = vst [vmem:[#allocation9_spill] sm:$0xff] %v5818_v50  ;;  %vm6605_vm2 = vcmp.eq.s32.totalorder %v5309_v61, %v5778_v28  ;;  %v4957_v28 = vld [vmem:[%s6555_s0] sm:$0xff] }
 0x1c2   :  { %v4394_v39 = vpack.c.bf16 %v4836_v32, %v4835_v49 }
 0x1c3   :  { %v5822_v21 = vpop.permute.xlu1 %443  ;;  %3914 = vmatmul.mubr.msk.f32.gmra.mrb[30].mxu1 %vm6603_vm14, %v6623_v63  ;;  %v5836_v18 = vpop.permute.xlu0 %458 }
 0x1c4   :  { %6661 = vst [vmem:[#allocation10_spill] sm:$0xff] %v5822_v21  ;;  %4395 = vmatprep.subr.bf16.mxu1 %v4394_v39  ;;  %3948 = vmatprep.mubr.msk.f32.mxu1 %vm6602_vm15, %v6623_v63  ;;  %6663 = vst [vmem:[#allocation12_spill] sm:$0xff] %v5836_v18  ;;  %vm6604_vm1 = vcmp.eq.s32.totalorder %v5309_v61, %v5822_v21  ;;  %vm6607_vm15 = vcmp.eq.s32.totalorder %v5309_v61, %v5798_v38 }
 0x1c5   :  { %4397 = vmatpush3.bf16.msra.mxu1 %v4394_v39 }
 0x1c7   :  { %v5834_v29 = vpop.permute.xlu1 %449  ;;  %v5862_v33 = vpop.permute.xlu0 %464 }
 0x1c8   :  { %6662 = vst [vmem:[#allocation11_spill] sm:$0xff] %v5834_v29  ;;  %3949 = vmatmul.mubr.msk.f32.vlgmr.msra.gmra.mrb[16].mxu1 %vm6605_vm2, %v6623_v63  ;;  %vm6606_vm14 = vcmp.eq.s32.totalorder %v5309_v61, %v5834_v29  ;;  %6665 = vst [vmem:[#allocation14_spill] sm:$0xff] %v5862_v33 }
 0x1c9   :  { %3951 = vmatprep.mubr.msk.f32.mxu1 %vm6604_vm1, %v6623_v63  ;;  %vm6609_vm1 = vcmp.eq.s32.totalorder %v5309_v61, %v5818_v50 }
 0x1cb   :  { %v5850_v25 = vpop.permute.xlu1 %455  ;;  %v5882_v49 = vpop.permute.xlu0 %470 }
 0x1cc   :  { %6664 = vst [vmem:[#allocation13_spill] sm:$0xff] %v5850_v25  ;;  %3952 = vmatmul.mubr.msk.f32.gmra.mrb[18].mxu1 %vm6607_vm15, %v6623_v63  ;;  %vm6608_vm2 = vcmp.eq.s32.totalorder %v5309_v61, %v5850_v25  ;;  %6668 = vst [vmem:[#allocation17_spill] sm:$0xff] %v5882_v49 }
 0x1cd   :  { %3954 = vmatprep.mubr.msk.f32.mxu1 %vm6606_vm14, %v6623_v63  ;;  %vm6612_vm14 = vcmp.eq.s32.totalorder %v5309_v61, %v5836_v18  ;;  %v2083_v18 = vld [vmem:[%s6560_s7] sm:$0xff] }
 0x1cf   :  { %v5866_v40 = vpop.permute.xlu1 %461 }
 0x1d0   :  { %6666 = vst [vmem:[#allocation15_spill] sm:$0xff] %v5866_v40  ;;  %3955 = vmatmul.mubr.msk.f32.gmra.mrb[20].mxu1 %vm6609_vm1, %v6623_v63  ;;  %vm6611_vm15 = vcmp.eq.s32.totalorder %v5309_v61, %v5866_v40  ;;  %v5908_v40 = vpop.permute.xlu0 %476 }
 0x1d1   :  { %3957 = vmatprep.mubr.msk.f32.mxu1 %vm6608_vm2, %v6623_v63  ;;  %vm6616_vm2 = vcmp.eq.s32.totalorder %v5309_v61, %v5862_v33  ;;  %6670 = vst [vmem:[#allocation19_spill] sm:$0xff] %v5908_v40 }
 0x1d3   :  { %v5880_v32 = vpop.permute.xlu1 %467 }
 0x1d4   :  { %6667 = vst [vmem:[#allocation16_spill] sm:$0xff] %v5880_v32  ;;  %3958 = vmatmul.mubr.msk.f32.gmra.mrb[22].mxu1 %vm6612_vm14, %v6623_v63  ;;  %vm6614_vm1 = vcmp.eq.s32.totalorder %v5309_v61, %v5880_v32  ;;  %v5926_v32 = vpop.permute.xlu0 %482 }
 0x1d5   :  { %3960 = vmatprep.mubr.msk.f32.mxu1 %vm6611_vm15, %v6623_v63  ;;  %vm495_vm15 = vcmp.eq.s32.totalorder %v5309_v61, %v5882_v49  ;;  %6672 = vst [vmem:[#allocation21_spill] sm:$0xff] %v5926_v32 }
 0x1d7   :  { %v5896_v39 = vpop.permute.xlu1 %473 }
 0x1d8   :  { %6669 = vst [vmem:[#allocation18_spill] sm:$0xff] %v5896_v39  ;;  %3961 = vmatmul.mubr.msk.f32.gmra.mrb[24].mxu1 %vm6616_vm2, %v6623_v63  ;;  %vm6617_vm14 = vcmp.eq.s32.totalorder %v5309_v61, %v5896_v39  ;;  %v1886_v39 = vld [vmem:[%s6559_s6] sm:$0xff] }
 0x1d9   :  { %3963 = vmatprep.mubr.msk.f32.mxu1 %vm6614_vm1, %v6623_v63  ;;  %vm497_vm1 = vcmp.eq.s32.totalorder %v5309_v61, %v5908_v40  ;;  %v1887_v40 = vld [vmem:[%s6559_s6 + $0x8] sm:$0xff] }
 0x1da   :  { %v4398_v49 = vpack.c.bf16 %v1887_v40, %v1886_v39  ;;  %v2084_v40 = vld [vmem:[%s6560_s7 + $0x8] sm:$0xf]  ;;  %v5967_v39 = vld [vmem:[%s6561_s5] ss:$0 sm:$0xff] }
 0x1db   :  { %v5918_v33 = vpop.permute.xlu1 %479 }
 0x1dc   :  { %3964 = vmatmul.mubr.msk.f32.gmra.mrb[26].mxu1 %vm495_vm15, %v6623_v63  ;;  %6671 = vst [vmem:[#allocation20_spill] sm:$0xff] %v5918_v33  ;;  %vm498_vm2 = vcmp.eq.s32.totalorder %v5309_v61, %v5918_v33  ;;  %4399 = vmatprep.subr.bf16.mxu0 %v4398_v49  ;;  %v1888_v33 = vld [vmem:[%s6559_s6 + $0x10] sm:$0xff] }
 0x1dd   :  { %3966 = vmatprep.mubr.msk.f32.mxu1 %vm6617_vm14, %v6623_v63  ;;  %vm499_vm14 = vcmp.eq.s32.totalorder %v5309_v61, %v5926_v32  ;;  %4401 = vmatpush3.bf16.msra.mxu0 %v4398_v49  ;;  %v1889_v32 = vld [vmem:[%s6559_s6 + $0x18] sm:$0xff]  ;;  %v4406_v49 = vpack.c.bf16 %v2084_v40, %v2083_v18 }
 0x1e0   :  { %3967 = vmatmul.mubr.msk.f32.gmra.mrb[28].mxu1 %vm497_vm1, %v6623_v63 }
 0x1e1   :  { %3969 = vmatprep.mubr.msk.f32.mxu1 %vm498_vm2, %v6623_v63 }
 0x1e4   :  { %3970 = vmatmul.mubr.msk.f32.gmra.mrb[30].mxu1 %vm499_vm14, %v6623_v63  ;;  %v4402_v63 = vpack.c.bf16 %v1889_v32, %v1888_v33 }
 0x1e6   :  { %4403 = vmatprep.subr.bf16.mxu0 %v4402_v63 }
 0x1e7   :  { %4405 = vmatpush3.bf16.msra.mxu0 %v4402_v63 }
 0x1e8   :  { %4408 = vmatprep.subr.msk.bf16.mxu0 %vm5238_vm3, %v4406_v49 }
 0x29b   :  { %v3950_v33 = vpop.f32.mrb[16].mxu1 }
 0x29c   :  { %v4540_v63 = vadd.f32 %v3950_v33, %v5967_v39  ;;  %v1759_v32 = vpop.f32.mrb[17].mxu1  ;;  %v4958_v33 = vld [vmem:[%s6555_s0 + $0x8] sm:$0xff] }
 0x29d   :  { %v4541_v25 = vadd.f32 %v5967_v39, %v1759_v32 }
 0x29e   :  { %v1855_v50 = vmax.f32 %v4540_v63, 0.0 }
 0x29f   :  { %v1854_v29 = vmax.f32 %v4541_v25, 0.0  ;;  %v3953_v38 = vpop.f32.mrb[18].mxu1 }
 0x2a0   :  { %v4542_v21 = vadd.f32 %v3953_v38, %v5967_v39  ;;  %v1769_v18 = vpop.f32.mrb[19].mxu1  ;;  %v5981_v23 = vadd.f32 %v4958_v33, %v1855_v50 }
 0x2a1   :  { %v4543_v40 = vadd.f32 %v5967_v39, %v1769_v18  ;;  %v5976_v36 = vadd.f32 %v4957_v28, %v1854_v29  ;;  %v4959_v28 = vld [vmem:[%s6555_s0 + $0x10] sm:$0xff] }
 0x2a2   :  { %6674 = vst [vmem:[#allocation23_spill] sm:$0xff] %v5981_v23  ;;  %v1857_v63 = vmax.f32 %v4542_v21, 0.0  ;;  %v4960_v21 = vld [vmem:[%s6555_s0 + $0x18] sm:$0xff] }
 0x2a3   :  { %6673 = vst [vmem:[#allocation22_spill] sm:$0xff] %v5976_v36  ;;  %v1856_v25 = vmax.f32 %v4543_v40, 0.0  ;;  %v3956_v32 = vpop.f32.mrb[20].mxu1  ;;  %3980 = vmatprep.mubr.msk.f32.mxu0 %vm585_vm0, %v5976_v36 }
 0x2a4   :  { %v4544_v38 = vadd.f32 %v3956_v32, %v5967_v39  ;;  %v1779_v18 = vpop.f32.mrb[21].mxu1  ;;  %3981 = vmatmul.mubr.msk.f32.vlgmr.msra.gmra.mrb[0].mxu0 %vm585_vm0, %v5981_v23  ;;  %v5999_v40 = vadd.f32 %v4960_v21, %v1857_v63 }
 0x2a5   :  { %v5991_v29 = vadd.f32 %v4959_v28, %v1856_v25  ;;  %v4545_v50 = vadd.f32 %v5967_v39, %v1779_v18  ;;  %4411 = vmatpush3.bf16.msk.msra.mxu0 %vm5238_vm3, %v4406_v49  ;;  %vm6690_vm3 = vcmp.eq.s32.totalorder %v5309_v61, %v5396_v56 }
 0x2a6   :  { %6676 = vst [vmem:[#allocation25_spill] sm:$0xff] %v5999_v40  ;;  %v1859_v33 = vmax.f32 %v4544_v38, 0.0  ;;  %v4962_v38 = vld [vmem:[%s6555_s0 + $0x28] sm:$0xff] }
 0x2a7   :  { %6675 = vst [vmem:[#allocation24_spill] sm:$0xff] %v5991_v29  ;;  %v1858_v32 = vmax.f32 %v4545_v50, 0.0  ;;  %v3959_v36 = vpop.f32.mrb[22].mxu1  ;;  %3983 = vmatprep.mubr.msk.f32.mxu0 %vm585_vm0, %v5991_v29 }
 0x2a8   :  { %v4546_v25 = vadd.f32 %v3959_v36, %v5967_v39  ;;  %v1789_v28 = vpop.f32.mrb[23].mxu1  ;;  %3984 = vmatmul.mubr.msk.f32.gmra.mrb[2].mxu0 %vm585_vm0, %v5999_v40  ;;  %v6015_v18 = vadd.f32 %v4962_v38, %v1859_v33 }
 0x2a9   :  { %v6009_v49 = vadd.f32 %v4961_v43, %v1858_v32  ;;  %v4547_v63 = vadd.f32 %v5967_v39, %v1789_v28  ;;  %v4963_v32 = vld [vmem:[%s6555_s0 + $0x30] sm:$0xff] }
 0x2aa   :  { %6678 = vst [vmem:[#allocation27_spill] sm:$0xff] %v6015_v18  ;;  %v1861_v50 = vmax.f32 %v4546_v25, 0.0  ;;  %v4964_v25 = vld [vmem:[%s6555_s0 + $0x38] sm:$0xff] }
 0x2ab   :  { %6677 = vst [vmem:[#allocation26_spill] sm:$0xff] %v6009_v49  ;;  %v1860_v36 = vmax.f32 %v4547_v63, 0.0  ;;  %v3962_v21 = vpop.f32.mrb[24].mxu1  ;;  %3986 = vmatprep.mubr.msk.f32.mxu0 %vm585_vm0, %v6009_v49 }
 0x2ac   :  { %v4548_v29 = vadd.f32 %v3962_v21, %v5967_v39  ;;  %v1799_v40 = vpop.f32.mrb[25].mxu1  ;;  %3987 = vmatmul.mubr.msk.f32.gmra.mrb[4].mxu0 %vm585_vm0, %v6015_v18  ;;  %v6031_v43 = vadd.f32 %v4964_v25, %v1861_v50 }
 0x2ad   :  { %v6025_v28 = vadd.f32 %v4963_v32, %v1860_v36  ;;  %v4549_v33 = vadd.f32 %v5967_v39, %v1799_v40  ;;  %v4965_v40 = vld [vmem:[%s6555_s0 + $0x40] sm:$0xff] }
 0x2ae   :  { %6680 = vst [vmem:[#allocation29_spill] sm:$0xff] %v6031_v43  ;;  %v1863_v63 = vmax.f32 %v4548_v29, 0.0  ;;  %v4966_v29 = vld [vmem:[%s6555_s0 + $0x48] sm:$0xff] }
 0x2af   :  { %6679 = vst [vmem:[#allocation28_spill] sm:$0xff] %v6025_v28  ;;  %v1862_v38 = vmax.f32 %v4549_v33, 0.0  ;;  %v3965_v21 = vpop.f32.mrb[26].mxu1  ;;  %3989 = vmatprep.mubr.msk.f32.mxu0 %vm585_vm0, %v6025_v28 }
 0x2b0   :  { %v4550_v49 = vadd.f32 %v3965_v21, %v5967_v39  ;;  %v1809_v18 = vpop.f32.mrb[27].mxu1  ;;  %3990 = vmatmul.mubr.msk.f32.gmra.mrb[6].mxu0 %vm585_vm0, %v6031_v43  ;;  %v6047_v32 = vadd.f32 %v4966_v29, %v1863_v63 }
 0x2b1   :  { %v6041_v36 = vadd.f32 %v4965_v40, %v1862_v38  ;;  %v4551_v50 = vadd.f32 %v5967_v39, %v1809_v18  ;;  %v4967_v18 = vld [vmem:[%s6555_s0 + $0x50] sm:$0xff] }
 0x2b2   :  { %6682 = vst [vmem:[#allocation31_spill] sm:$0xff] %v6047_v32  ;;  %v1865_v33 = vmax.f32 %v4550_v49, 0.0  ;;  %v4968_v49 = vld [vmem:[%s6555_s0 + $0x58] sm:$0xff] }
 0x2b3   :  { %6681 = vst [vmem:[#allocation30_spill] sm:$0xff] %v6041_v36  ;;  %v1864_v25 = vmax.f32 %v4551_v50, 0.0  ;;  %v3968_v21 = vpop.f32.mrb[28].mxu1  ;;  %3992 = vmatprep.mubr.msk.f32.mxu0 %vm585_vm0, %v6041_v36 }
 0x2b4   :  { %v4552_v28 = vadd.f32 %v3968_v21, %v5967_v39  ;;  %v1819_v43 = vpop.f32.mrb[29].mxu1  ;;  %3993 = vmatmul.mubr.msk.f32.gmra.mrb[8].mxu0 %vm585_vm0, %v6047_v32  ;;  %v6063_v40 = vadd.f32 %v4968_v49, %v1865_v33 }
 0x2b5   :  { %v6057_v38 = vadd.f32 %v4967_v18, %v1864_v25  ;;  %v4553_v63 = vadd.f32 %v5967_v39, %v1819_v43  ;;  %v4969_v43 = vld [vmem:[%s6555_s0 + $0x60] sm:$0xff] }
 0x2b6   :  { %6684 = vst [vmem:[#allocation33_spill] sm:$0xff] %v6063_v40  ;;  %v1867_v50 = vmax.f32 %v4552_v28, 0.0  ;;  %v4970_v28 = vld [vmem:[%s6555_s0 + $0x68] sm:$0xff] }
 0x2b7   :  { %6683 = vst [vmem:[#allocation32_spill] sm:$0xff] %v6057_v38  ;;  %v1866_v29 = vmax.f32 %v4553_v63, 0.0  ;;  %v3971_v21 = vpop.f32.mrb[30].mxu1  ;;  %3995 = vmatprep.mubr.msk.f32.mxu0 %vm585_vm0, %v6057_v38 }
 0x2b8   :  { %v4554_v36 = vadd.f32 %v3971_v21, %v5967_v39  ;;  %v1829_v32 = vpop.f32.mrb[31].mxu1  ;;  %3996 = vmatmul.mubr.msk.f32.gmra.mrb[10].mxu0 %vm585_vm0, %v6063_v40  ;;  %v6079_v18 = vadd.f32 %v4970_v28, %v1867_v50  ;;  %v4974_v50 = vld [vmem:[%s6558_s1 + $0x8] sm:$0xff]  ;;  %v4977_v28 = vld [vmem:[%s6558_s1 + $0x20] sm:$0xff] }
 0x2b9   :  { %v6073_v25 = vadd.f32 %v4969_v43, %v1866_v29  ;;  %v4555_v33 = vadd.f32 %v5967_v39, %v1829_v32  ;;  %v4971_v29 = vld [vmem:[%s6555_s0 + $0x70] sm:$0xff]  ;;  %v4972_v39 = vld [vmem:[%s6555_s0 + $0x78] sm:$0xff] }
 0x2ba   :  { %6686 = vst [vmem:[#allocation35_spill] sm:$0xff] %v6079_v18  ;;  %v1869_v63 = vmax.f32 %v4554_v36, 0.0  ;;  %v4973_v36 = vld [vmem:[%s6558_s1] sm:$0xff]  ;;  %v4975_v43 = vld [vmem:[%s6558_s1 + $0x10] sm:$0xff] }
 0x2bb   :  { %6685 = vst [vmem:[#allocation34_spill] sm:$0xff] %v6073_v25  ;;  %v1868_v49 = vmax.f32 %v4555_v33, 0.0  ;;  %3998 = vmatprep.mubr.msk.f32.mxu0 %vm585_vm0, %v6073_v25  ;;  %v4976_v33 = vld [vmem:[%s6558_s1 + $0x18] sm:$0xff] }
 0x2bc   :  { %3999 = vmatmul.mubr.msk.f32.gmra.mrb[12].mxu0 %vm585_vm0, %v6079_v18  ;;  %v6093_v32 = vadd.f32 %v4972_v39, %v1869_v63  ;;  %v4978_v63 = vld [vmem:[%s6558_s1 + $0x28] sm:$0xff]  ;;  %v4981_v39 = vld [vmem:[%s6558_s1 + $0x40] sm:$0xff] }
 0x2bd   :  { %v6088_v21 = vadd.f32 %v4971_v29, %v1868_v49  ;;  %v4979_v49 = vld [vmem:[%s6558_s1 + $0x30] sm:$0xff]  ;;  %v4980_v29 = vld [vmem:[%s6558_s1 + $0x38] sm:$0xff] }
 0x2be   :  { %6688 = vst [vmem:[#allocation37_spill] sm:$0xff] %v6093_v32 }
 0x2bf   :  { %6687 = vst [vmem:[#allocation36_spill] sm:$0xff] %v6088_v21  ;;  %4001 = vmatprep.mubr.msk.f32.mxu0 %vm585_vm0, %v6088_v21 }
 0x2c0   :  { %4002 = vmatmul.mubr.msk.f32.gmra.mrb[14].mxu0 %vm585_vm0, %v6093_v32 }
 0x2c1   :  { %4008 = vmatprep.mubr.msk.f32.mxu0 %vm788_vm4, %v4973_v36  ;;  %v4982_v36 = vld [vmem:[%s6558_s1 + $0x48] sm:$0xff] }
 0x2c4   :  { %4009 = vmatmul.mubr.msk.f32.vlgmr.msra.gmra.mrb[16].mxu0 %vm788_vm4, %v4974_v50  ;;  %v4983_v50 = vld [vmem:[%s6558_s1 + $0x50] sm:$0xff] }
 0x2c5   :  { %4011 = vmatprep.mubr.msk.f32.mxu0 %vm788_vm4, %v4975_v43  ;;  %v4984_v43 = vld [vmem:[%s6558_s1 + $0x58] sm:$0xff] }
 0x2c8   :  { %4012 = vmatmul.mubr.msk.f32.gmra.mrb[18].mxu0 %vm788_vm4, %v4976_v33  ;;  %v4985_v33 = vld [vmem:[%s6558_s1 + $0x60] sm:$0xff] }
 0x2c9   :  { %4014 = vmatprep.mubr.msk.f32.mxu0 %vm788_vm4, %v4977_v28  ;;  %v4986_v28 = vld [vmem:[%s6558_s1 + $0x68] sm:$0xff] }
 0x2cc   :  { %4015 = vmatmul.mubr.msk.f32.gmra.mrb[20].mxu0 %vm788_vm4, %v4978_v63  ;;  %v4987_v63 = vld [vmem:[%s6558_s1 + $0x70] sm:$0xff] }
 0x2cd   :  { %4017 = vmatprep.mubr.msk.f32.mxu0 %vm788_vm4, %v4979_v49  ;;  %v4988_v49 = vld [vmem:[%s6558_s1 + $0x78] sm:$0xff] }
 0x2d0   :  { %4018 = vmatmul.mubr.msk.f32.gmra.mrb[22].mxu0 %vm788_vm4, %v4980_v29  ;;  %v6689_v29 = vmov 1.0  }
 0x2d1   :  { %4020 = vmatprep.mubr.msk.f32.mxu0 %vm788_vm4, %v4981_v39 }
 0x2d4   :  { %4021 = vmatmul.mubr.msk.f32.gmra.mrb[24].mxu0 %vm788_vm4, %v4982_v36 }
 0x2d5   :  { %4023 = vmatprep.mubr.msk.f32.mxu0 %vm788_vm4, %v4983_v50 }
 0x2d8   :  { %4024 = vmatmul.mubr.msk.f32.gmra.mrb[26].mxu0 %vm788_vm4, %v4984_v43 }
 0x2d9   :  { %4026 = vmatprep.mubr.msk.f32.mxu0 %vm788_vm4, %v4985_v33 }
 0x2dc   :  { %4027 = vmatmul.mubr.msk.f32.gmra.mrb[28].mxu0 %vm788_vm4, %v4986_v28 }
 0x2dd   :  { %4029 = vmatprep.mubr.msk.f32.mxu0 %vm788_vm4, %v4987_v63 }
 0x2e0   :  { %4030 = vmatmul.mubr.msk.f32.gmra.mrb[30].mxu0 %vm788_vm4, %v4988_v49  ;;  %vm6691_vm4 = vcmp.eq.s32.totalorder %v5309_v61, %v5419_v59 }
 0x2e1   :  { %4064 = vmatprep.mubr.msk.f32.mxu0 %vm98_vm5, %v6689_v29  ;;  %vm6692_vm5 = vcmp.eq.s32.totalorder %v5309_v61, %v5431_v60 }
 0x377   :  { %v3982_v39 = vpop.f32.mrb[0].mxu0 }
 0x378   :  { %v2004_v36 = vpop.f32.mrb[1].mxu0 }
 0x379   :  { %v6167_v50 = vpack.i.bf16 %v3982_v39, %v2004_v36  ;;  %v4412_v43 = vpack.c.bf16 %v3982_v39, %v2004_v36 }
 0x37b   :  { %4838 = vrot.lane.b32.xlu1 %v6167_v50, %s4994_s25  ;;  %v3985_v33 = vpop.f32.mrb[2].mxu0  ;;  %4413 = vmatprep.subr.bf16.mxu0 %v4412_v43 }
 0x37c   :  { %v2014_v28 = vpop.f32.mrb[3].mxu0  ;;  %4415 = vmatpush3.bf16.msra.mxu0 %v4412_v43 }
 0x37d   :  { %v6171_v63 = vpack.i.bf16 %v3985_v33, %v2014_v28  ;;  %v4416_v49 = vpack.c.bf16 %v3985_v33, %v2014_v28 }
 0x37f   :  { %4843 = vrot.lane.b32.xlu0 %v6171_v63, %s4994_s25  ;;  %v3988_v62 = vpop.f32.mrb[4].mxu0  ;;  %4417 = vmatprep.subr.bf16.mxu0 %v4416_v49 }
 0x380   :  { %v2024_v21 = vpop.f32.mrb[5].mxu0  ;;  %4419 = vmatpush3.bf16.msra.mxu0 %v4416_v49 }
 0x381   :  { %v4927_v32 = vpack.i.bf16 %v3988_v62, %v2024_v21  ;;  %v4420_v25 = vpack.c.bf16 %v3988_v62, %v2024_v21 }
 0x383   :  { %4848 = vrot.lane.b32.xlu1 %v4927_v32, %s4994_s25  ;;  %v3991_v39 = vpop.f32.mrb[6].mxu0  ;;  %4421 = vmatprep.subr.bf16.mxu0 %v4420_v25 }
 0x384   :  { %v2034_v36 = vpop.f32.mrb[7].mxu0  ;;  %4423 = vmatpush3.bf16.msra.mxu0 %v4420_v25 }
 0x385   :  { %v4932_v18 = vpack.i.bf16 %v3991_v39, %v2034_v36  ;;  %v4424_v43 = vpack.c.bf16 %v3991_v39, %v2034_v36 }
 0x387   :  { %4853 = vrot.lane.b32.xlu0 %v4932_v18, %s4994_s25  ;;  %v3994_v33 = vpop.f32.mrb[8].mxu0  ;;  %4425 = vmatprep.subr.bf16.mxu0 %v4424_v43 }
 0x388   :  { %v2044_v28 = vpop.f32.mrb[9].mxu0  ;;  %4427 = vmatpush3.bf16.msra.mxu0 %v4424_v43 }
 0x389   :  { %v4937_v38 = vpack.i.bf16 %v3994_v33, %v2044_v28  ;;  %v4428_v40 = vpack.c.bf16 %v3994_v33, %v2044_v28 }
 0x38b   :  { %4858 = vrot.lane.b32.xlu1 %v4937_v38, %s4994_s25  ;;  %v3997_v49 = vpop.f32.mrb[10].mxu0  ;;  %4429 = vmatprep.subr.bf16.mxu0 %v4428_v40 }
 0x38c   :  { %v2054_v21 = vpop.f32.mrb[11].mxu0  ;;  %4431 = vmatpush3.bf16.msra.mxu0 %v4428_v40 }
 0x38d   :  { %v4942_v62 = vpack.i.bf16 %v3997_v49, %v2054_v21  ;;  %v4432_v23 = vpack.c.bf16 %v3997_v49, %v2054_v21 }
 0x38f   :  { %4863 = vrot.lane.b32.xlu0 %v4942_v62, %s4994_s25  ;;  %v4000_v25 = vpop.f32.mrb[12].mxu0  ;;  %4433 = vmatprep.subr.bf16.mxu0 %v4432_v23 }
 0x390   :  { %v2064_v39 = vpop.f32.mrb[13].mxu0  ;;  %4435 = vmatpush3.bf16.msra.mxu0 %v4432_v23 }
 0x391   :  { %v4947_v36 = vpack.i.bf16 %v4000_v25, %v2064_v39  ;;  %v4436_v44 = vpack.c.bf16 %v4000_v25, %v2064_v39 }
 0x393   :  { %4868 = vrot.lane.b32.xlu1 %v4947_v36, %s4994_s25  ;;  %v4003_v43 = vpop.f32.mrb[14].mxu0  ;;  %4437 = vmatprep.subr.bf16.mxu0 %v4436_v44 }
 0x394   :  { %v2074_v33 = vpop.f32.mrb[15].mxu0  ;;  %4439 = vmatpush3.bf16.msra.mxu0 %v4436_v44 }
 0x395   :  { %v4952_v28 = vpack.i.bf16 %v4003_v43, %v2074_v33  ;;  %v4440_v34 = vpack.c.bf16 %v4003_v43, %v2074_v33 }
 0x397   :  { %4878 = vrot.lane.b32.xlu1 %v6167_v50, %s4993_s24  ;;  %4873 = vrot.lane.b32.xlu0 %v4952_v28, %s4994_s25 }
 0x398   :  { %4441 = vmatprep.subr.bf16.mxu0 %v4440_v34 }
 0x399   :  { %4443 = vmatpush3.bf16.msra.mxu0 %v4440_v34 }
 0x39b   :  { %4888 = vrot.lane.b32.xlu1 %v4927_v32, %s4993_s24  ;;  %4883 = vrot.lane.b32.xlu0 %v6171_v63, %s4993_s24 }
 0x39c   :  { %4065 = vmatmul.mubr.msk.f32.vlgmr.msra.gmra.mrb[16].mxu0 %vm99_vm6, %v6689_v29  ;;  %vm6693_vm6 = vcmp.eq.s32.totalorder %v5309_v61, %v5454_v1 }
 0x39d   :  { %4067 = vmatprep.mubr.msk.f32.mxu0 %vm100_vm7, %v6689_v29  ;;  %vm6694_vm7 = vcmp.eq.s32.totalorder %v5309_v61, %v5448_v0 }
 0x39f   :  { %4898 = vrot.lane.b32.xlu1 %v4937_v38, %s4993_s24  ;;  %4893 = vrot.lane.b32.xlu0 %v4932_v18, %s4993_s24 }
 0x3a0   :  { %4068 = vmatmul.mubr.msk.f32.gmra.mrb[18].mxu0 %vm101_vm8, %v6689_v29  ;;  %vm6695_vm8 = vcmp.eq.s32.totalorder %v5309_v61, %v5471_v2 }
 0x3a1   :  { %4070 = vmatprep.mubr.msk.f32.mxu0 %vm102_vm9, %v6689_v29  ;;  %vm6696_vm9 = vcmp.eq.s32.totalorder %v5309_v61, %v5483_v3 }
 0x3a3   :  { %4908 = vrot.lane.b32.xlu1 %v4947_v36, %s4993_s24  ;;  %4903 = vrot.lane.b32.xlu0 %v4942_v62, %s4993_s24 }
 0x3a4   :  { %4071 = vmatmul.mubr.msk.f32.gmra.mrb[20].mxu0 %vm103_vm10, %v6689_v29  ;;  %vm6697_vm10 = vcmp.eq.s32.totalorder %v5309_v61, %v5500_v4 }
 0x3a5   :  { %4073 = vmatprep.mubr.msk.f32.mxu0 %vm104_vm11, %v6689_v29  ;;  %vm6698_vm11 = vcmp.eq.s32.totalorder %v5309_v61, %v5527_v5 }
 0x3a7   :  { %4918 = vrot.lane.b32.xlu1 %v6167_v50, %s4996_s26  ;;  %4913 = vrot.lane.b32.xlu0 %v4952_v28, %s4993_s24 }
 0x3a8   :  { %4074 = vmatmul.mubr.msk.f32.gmra.mrb[22].mxu0 %vm105_vm12, %v6689_v29  ;;  %vm6699_vm12 = vcmp.eq.s32.totalorder %v5309_v61, %v5533_v7 }
 0x3a9   :  { %4076 = vmatprep.mubr.msk.f32.mxu0 %vm106_vm13, %v6689_v29  ;;  %vm6700_vm13 = vcmp.eq.s32.totalorder %v5309_v61, %v5535_v10 }
 0x3ab   :  { %4928 = vrot.lane.b32.xlu1 %v4927_v32, %s4996_s26  ;;  %4923 = vrot.lane.b32.xlu0 %v6171_v63, %s4996_s26 }
 0x3ac   :  { %4077 = vmatmul.mubr.msk.f32.gmra.mrb[24].mxu0 %vm6690_vm3, %v6689_v29  ;;  %vm6701_vm3 = vcmp.eq.s32.totalorder %v5309_v61, %v5541_v14 }
 0x3ad   :  { %4079 = vmatprep.mubr.msk.f32.mxu0 %vm6691_vm4, %v6689_v29  ;;  %vm6702_vm4 = vcmp.eq.s32.totalorder %v5309_v61, %v5539_v12 }
 0x3af   :  { %4938 = vrot.lane.b32.xlu1 %v4937_v38, %s4996_s26  ;;  %4933 = vrot.lane.b32.xlu0 %v4932_v18, %s4996_s26 }
 0x3b0   :  { %4080 = vmatmul.mubr.msk.f32.gmra.mrb[26].mxu0 %vm6692_vm5, %v6689_v29  ;;  %vm6703_vm5 = vcmp.eq.s32.totalorder %v5309_v61, %v5548_v11 }
 0x3b1   :  { %4082 = vmatprep.mubr.msk.f32.mxu0 %vm6693_vm6, %v6689_v29  ;;  %vm6704_vm6 = vcmp.eq.s32.totalorder %v5309_v61, %v5550_v16 }
 0x3b3   :  { %4948 = vrot.lane.b32.xlu1 %v4947_v36, %s4996_s26  ;;  %4943 = vrot.lane.b32.xlu0 %v4942_v62, %s4996_s26 }
 0x3b4   :  { %4083 = vmatmul.mubr.msk.f32.gmra.mrb[28].mxu0 %vm6694_vm7, %v6689_v29  ;;  %vm6705_vm7 = vcmp.eq.s32.totalorder %v5309_v61, %v5556_v13 }
 0x3b5   :  { %4085 = vmatprep.mubr.msk.f32.mxu0 %vm6695_vm8, %v6689_v29  ;;  %vm6706_vm8 = vcmp.eq.s32.totalorder %v5309_v61, %v5554_v8 }
 0x3b7   :  { %4953 = vrot.lane.b32.xlu0 %v4952_v28, %s4996_s26 }
 0x3b8   :  { %4086 = vmatmul.mubr.msk.f32.gmra.mrb[30].mxu0 %vm6696_vm9, %v6689_v29  ;;  %vm6707_vm9 = vcmp.eq.s32.totalorder %v5309_v61, %v5562_v9 }
 0x3b9   :  { %4120 = vmatprep.mubr.msk.f32.mxu0 %vm6697_vm10, %v6689_v29  ;;  %vm6708_vm10 = vcmp.eq.s32.totalorder %v5309_v61, %v5564_v15 }
 0x3ed   :  { %v4839_v30 = vpop.permute.xlu1 %4838 }
 0x3ee   :  { %v4841_v41 = vunpack.i.h.bf16 %v4839_v30  ;;  %v4840_v42 = vunpack.i.l.bf16 %v4839_v30 }
 0x3f0   :  { %v4444_v48 = vpack.c.bf16 %v4841_v41, %v4840_v42 }
 0x3f1   :  { %v4844_v51 = vpop.permute.xlu0 %4843 }
 0x3f2   :  { %v4846_v54 = vunpack.i.h.bf16 %v4844_v51  ;;  %v4845_v55 = vunpack.i.l.bf16 %v4844_v51  ;;  %4445 = vmatprep.subr.bf16.mxu0 %v4444_v48 }
 0x3f3   :  { %4447 = vmatpush3.bf16.msra.mxu0 %v4444_v48 }
 0x3f4   :  { %v4448_v56 = vpack.c.bf16 %v4846_v54, %v4845_v55 }
 0x3f5   :  { %v4849_v58 = vpop.permute.xlu1 %4848 }
 0x3f6   :  { %v4851_v59 = vunpack.i.h.bf16 %v4849_v58  ;;  %v4850_v60 = vunpack.i.l.bf16 %v4849_v58  ;;  %4449 = vmatprep.subr.bf16.mxu0 %v4448_v56 }
 0x3f7   :  { %4451 = vmatpush3.bf16.msra.mxu0 %v4448_v56 }
 0x3f8   :  { %v4452_v0 = vpack.c.bf16 %v4851_v59, %v4850_v60 }
 0x3f9   :  { %v4854_v1 = vpop.permute.xlu0 %4853 }
 0x3fa   :  { %v4856_v2 = vunpack.i.h.bf16 %v4854_v1  ;;  %v4855_v3 = vunpack.i.l.bf16 %v4854_v1  ;;  %4453 = vmatprep.subr.bf16.mxu0 %v4452_v0 }
 0x3fb   :  { %4455 = vmatpush3.bf16.msra.mxu0 %v4452_v0 }
 0x3fc   :  { %v4456_v4 = vpack.c.bf16 %v4856_v2, %v4855_v3 }
 0x3fd   :  { %v4859_v34 = vpop.permute.xlu1 %4858 }
 0x3fe   :  { %v4861_v44 = vunpack.i.h.bf16 %v4859_v34  ;;  %v4860_v23 = vunpack.i.l.bf16 %v4859_v34  ;;  %4457 = vmatprep.subr.bf16.mxu0 %v4456_v4 }
 0x3ff   :  { %4459 = vmatpush3.bf16.msra.mxu0 %v4456_v4 }
 0x400   :  { %v4460_v38 = vpack.c.bf16 %v4861_v44, %v4860_v23 }
 0x401   :  { %v4864_v40 = vpop.permute.xlu0 %4863 }
 0x402   :  { %v4866_v18 = vunpack.i.h.bf16 %v4864_v40  ;;  %v4865_v32 = vunpack.i.l.bf16 %v4864_v40  ;;  %4461 = vmatprep.subr.bf16.mxu0 %v4460_v38 }
 0x403   :  { %4463 = vmatpush3.bf16.msra.mxu0 %v4460_v38 }
 0x404   :  { %v4464_v50 = vpack.c.bf16 %v4866_v18, %v4865_v32 }
 0x405   :  { %v4869_v63 = vpop.permute.xlu1 %4868 }
 0x406   :  { %v4871_v49 = vunpack.i.h.bf16 %v4869_v63  ;;  %v4870_v21 = vunpack.i.l.bf16 %v4869_v63  ;;  %4465 = vmatprep.subr.bf16.mxu0 %v4464_v50 }
 0x407   :  { %4467 = vmatpush3.bf16.msra.mxu0 %v4464_v50 }
 0x408   :  { %v4468_v62 = vpack.c.bf16 %v4871_v49, %v4870_v21 }
 0x409   :  { %v4879_v25 = vpop.permute.xlu1 %4878  ;;  %v4874_v39 = vpop.permute.xlu0 %4873 }
 0x40a   :  { %v4881_v36 = vunpack.i.h.bf16 %v4879_v25  ;;  %v4880_v43 = vunpack.i.l.bf16 %v4879_v25  ;;  %v4876_v33 = vunpack.i.h.bf16 %v4874_v39  ;;  %v4875_v28 = vunpack.i.l.bf16 %v4874_v39  ;;  %4469 = vmatprep.subr.bf16.mxu0 %v4468_v62 }
 0x40b   :  { %4471 = vmatpush3.bf16.msra.mxu0 %v4468_v62 }
 0x40c   :  { %v4472_v30 = vpack.c.bf16 %v4876_v33, %v4875_v28  ;;  %v4476_v42 = vpack.c.bf16 %v4881_v36, %v4880_v43 }
 0x40d   :  { %v4884_v41 = vpop.permute.xlu0 %4883  ;;  %v4889_v54 = vpop.permute.xlu1 %4888 }
 0x40e   :  { %v4886_v48 = vunpack.i.h.bf16 %v4884_v41  ;;  %v4885_v51 = vunpack.i.l.bf16 %v4884_v41  ;;  %4473 = vmatprep.subr.bf16.mxu0 %v4472_v30  ;;  %v4891_v55 = vunpack.i.h.bf16 %v4889_v54  ;;  %v4890_v56 = vunpack.i.l.bf16 %v4889_v54  ;;  %v6736_v54 = vld [vmem:[#allocation10_spill] sm:$0xff] }
 0x40f   :  { %4475 = vmatpush3.bf16.msra.mxu0 %v4472_v30 }
 0x410   :  { %4477 = vmatprep.subr.bf16.mxu0 %v4476_v42  ;;  %v4480_v58 = vpack.c.bf16 %v4886_v48, %v4885_v51  ;;  %v4484_v60 = vpack.c.bf16 %v4891_v55, %v4890_v56  ;;  %v6728_v48 = vld [vmem:[#allocation4_spill] sm:$0xff]  ;;  %v6734_v51 = vld [vmem:[#allocation6_spill] sm:$0xff]  ;;  %v6740_v56 = vld [vmem:[#allocation11_spill] sm:$0xff] }
 0x411   :  { %v4894_v59 = vpop.permute.xlu0 %4893  ;;  %v4899_v2 = vpop.permute.xlu1 %4898  ;;  %v6738_v55 = vld [vmem:[#allocation8_spill] sm:$0xff] }
 0x412   :  { %4121 = vmatmul.mubr.msk.f32.vlgmr.msra.gmra.mrb[16].mxu0 %vm6698_vm11, %v6689_v29  ;;  %v4896_v0 = vunpack.i.h.bf16 %v4894_v59  ;;  %v4895_v1 = vunpack.i.l.bf16 %v4894_v59  ;;  %v4901_v5 = vunpack.i.h.bf16 %v4899_v2  ;;  %v4900_v7 = vunpack.i.l.bf16 %v4899_v2  ;;  %v6744_v59 = vld [vmem:[#allocation13_spill] sm:$0xff]  ;;  %v6752_v2 = vld [vmem:[#allocation16_spill] sm:$0xff] }
 0x413   :  { %4123 = vmatprep.mubr.msk.f32.mxu0 %vm6699_vm12, %v6689_v29  ;;  %4479 = vmatpush3.bf16.msra.mxu0 %v4476_v42  ;;  %vm6709_vm11 = vcmp.eq.s32.totalorder %v5309_v61, %v5578_v52  ;;  %vm6710_vm12 = vcmp.eq.s32.totalorder %v5309_v61, %v5580_v53 }
 0x414   :  { %4481 = vmatprep.subr.bf16.mxu0 %v4480_v58  ;;  %v4488_v3 = vpack.c.bf16 %v4896_v0, %v4895_v1  ;;  %v4492_v10 = vpack.c.bf16 %v4901_v5, %v4900_v7  ;;  %v6748_v0 = vld [vmem:[#allocation15_spill] sm:$0xff]  ;;  %v6750_v1 = vld [vmem:[#allocation14_spill] sm:$0xff] }
 0x415   :  { %v4904_v4 = vpop.permute.xlu0 %4903  ;;  %v4909_v44 = vpop.permute.xlu1 %4908  ;;  %v6755_v7 = vld [vmem:[#allocation18_spill] sm:$0xff] }
 0x416   :  { %4124 = vmatmul.mubr.msk.f32.gmra.mrb[18].mxu0 %vm6700_vm13, %v6689_v29  ;;  %v4906_v14 = vunpack.i.h.bf16 %v4904_v4  ;;  %v4905_v34 = vunpack.i.l.bf16 %v4904_v4  ;;  %v4911_v12 = vunpack.i.h.bf16 %v4909_v44  ;;  %v4910_v11 = vunpack.i.l.bf16 %v4909_v44  ;;  %v6771_v4 = vld [vmem:[#allocation32_spill] sm:$0xff] }
 0x417   :  { %4126 = vmatprep.mubr.msk.f32.mxu0 %vm6701_vm3, %v6689_v29  ;;  %4483 = vmatpush3.bf16.msra.mxu0 %v4480_v58  ;;  %vm6711_vm13 = vcmp.eq.s32.totalorder %v5309_v61, %v5586_v26  ;;  %vm6712_vm3 = vcmp.eq.s32.totalorder %v5309_v61, %v5584_v24  ;;  %v6742_v58 = vld [vmem:[#allocation9_spill] sm:$0xff] }
 0x418   :  { %4485 = vmatprep.subr.bf16.mxu0 %v4484_v60  ;;  %v4496_v23 = vpack.c.bf16 %v4906_v14, %v4905_v34  ;;  %v4500_v16 = vpack.c.bf16 %v4911_v12, %v4910_v11  ;;  %v6456_v14 = vld [vmem:[%s6562_s8] ss:$0 sm:$0xff] }
 0x419   :  { %v4914_v38 = vpop.permute.xlu0 %4913  ;;  %v4919_v18 = vpop.permute.xlu1 %4918 }
 0x41a   :  { %4127 = vmatmul.mubr.msk.f32.gmra.mrb[20].mxu0 %vm6702_vm4, %v6689_v29  ;;  %v4916_v13 = vunpack.i.h.bf16 %v4914_v38  ;;  %v4915_v40 = vunpack.i.l.bf16 %v4914_v38  ;;  %v4921_v8 = vunpack.i.h.bf16 %v4919_v18  ;;  %v4920_v9 = vunpack.i.l.bf16 %v4919_v18 }
 0x41b   :  { %4129 = vmatprep.mubr.msk.f32.mxu0 %vm6703_vm5, %v6689_v29  ;;  %4487 = vmatpush3.bf16.msra.mxu0 %v4484_v60  ;;  %vm6713_vm4 = vcmp.eq.s32.totalorder %v5309_v61, %v5596_v35  ;;  %vm6714_vm5 = vcmp.eq.s32.totalorder %v5309_v61, %v5608_v19  ;;  %v6746_v60 = vld [vmem:[#allocation12_spill] sm:$0xff] }
 0x41c   :  { %4489 = vmatprep.subr.bf16.mxu0 %v4488_v3  ;;  %v4504_v32 = vpack.c.bf16 %v4916_v13, %v4915_v40  ;;  %v4508_v15 = vpack.c.bf16 %v4921_v8, %v4920_v9  ;;  %v6760_v13 = vld [vmem:[#allocation23_spill] sm:$0xff] }
 0x41d   :  { %v4924_v50 = vpop.permute.xlu0 %4923  ;;  %v4929_v49 = vpop.permute.xlu1 %4928 }
 0x41e   :  { %4130 = vmatmul.mubr.msk.f32.gmra.mrb[22].mxu0 %vm6704_vm6, %v6689_v29  ;;  %v4926_v52 = vunpack.i.h.bf16 %v4924_v50  ;;  %v4925_v63 = vunpack.i.l.bf16 %v4924_v50  ;;  %v4931_v53 = vunpack.i.h.bf16 %v4929_v49  ;;  %v4930_v26 = vunpack.i.l.bf16 %v4929_v49 }
 0x41f   :  { %4132 = vmatprep.mubr.msk.f32.mxu0 %vm6705_vm7, %v6689_v29  ;;  %4491 = vmatpush3.bf16.msra.mxu0 %v4488_v3  ;;  %vm6715_vm6 = vcmp.eq.s32.totalorder %v5309_v61, %v5614_v46  ;;  %vm6716_vm7 = vcmp.eq.s32.totalorder %v5309_v61, %v5626_v47 }
 0x420   :  { %4493 = vmatprep.subr.bf16.mxu0 %v4492_v10  ;;  %v4512_v21 = vpack.c.bf16 %v4926_v52, %v4925_v63  ;;  %v4516_v24 = vpack.c.bf16 %v4931_v53, %v4930_v26  ;;  %v6762_v52 = vld [vmem:[#allocation25_spill] sm:$0xff]  ;;  %v6763_v26 = vld [vmem:[#allocation24_spill] sm:$0xff] }
 0x421   :  { %v4934_v62 = vpop.permute.xlu0 %4933  ;;  %v4939_v39 = vpop.permute.xlu1 %4938 }
 0x422   :  { %4133 = vmatmul.mubr.msk.f32.gmra.mrb[24].mxu0 %vm6706_vm8, %v6689_v29  ;;  %v4936_v35 = vunpack.i.h.bf16 %v4934_v62  ;;  %v4935_v25 = vunpack.i.l.bf16 %v4934_v62  ;;  %vm6717_vm8 = vcmp.eq.s32.totalorder %v5309_v61, %v5642_v6  ;;  %v4941_v19 = vunpack.i.h.bf16 %v4939_v39 }
 0x423   :  { %4135 = vmatprep.mubr.msk.f32.mxu0 %vm6707_vm9, %v6689_v29  ;;  %4495 = vmatpush3.bf16.msra.mxu0 %v4492_v10  ;;  %v4940_v46 = vunpack.i.l.bf16 %v4939_v39  ;;  %vm6718_vm9 = vcmp.eq.s32.totalorder %v5309_v61, %v5648_v20  ;;  %v6764_v39 = vld [vmem:[#allocation27_spill] sm:$0xff] }
 0x424   :  { %4497 = vmatprep.subr.bf16.mxu0 %v4496_v23  ;;  %v4520_v36 = vpack.c.bf16 %v4936_v35, %v4935_v25 }
 0x425   :  { %v4944_v43 = vpop.permute.xlu0 %4943  ;;  %v4524_v47 = vpack.c.bf16 %v4941_v19, %v4940_v46  ;;  %v4949_v28 = vpop.permute.xlu1 %4948 }
 0x426   :  { %4136 = vmatmul.mubr.msk.f32.gmra.mrb[26].mxu0 %vm6708_vm10, %v6689_v29  ;;  %vm6719_vm10 = vcmp.eq.s32.totalorder %v5309_v61, %v5662_v22  ;;  %v4946_v6 = vunpack.i.h.bf16 %v4944_v43  ;;  %v4945_v33 = vunpack.i.l.bf16 %v4944_v43  ;;  %v4951_v20 = vunpack.i.h.bf16 %v4949_v28  ;;  %v6765_v43 = vld [vmem:[#allocation26_spill] sm:$0xff] }
 0x427   :  { %4138 = vmatprep.mubr.msk.f32.mxu0 %vm6709_vm11, %v6689_v29  ;;  %4499 = vmatpush3.bf16.msra.mxu0 %v4496_v23  ;;  %vm6720_vm11 = vcmp.eq.s32.totalorder %v5309_v61, %v5674_v27  ;;  %v4950_v22 = vunpack.i.l.bf16 %v4949_v28 }
 0x428   :  { %4501 = vmatprep.subr.bf16.mxu0 %v4500_v16  ;;  %v4528_v30 = vpack.c.bf16 %v4946_v6, %v4945_v33 }
 0x429   :  { %v4954_v41 = vpop.permute.xlu0 %4953  ;;  %v4532_v27 = vpack.c.bf16 %v4951_v20, %v4950_v22  ;;  %v6766_v22 = vld [vmem:[#allocation29_spill] sm:$0xff] }
 0x42a   :  { %4139 = vmatmul.mubr.msk.f32.gmra.mrb[28].mxu0 %vm6710_vm12, %v6689_v29  ;;  %vm6721_vm12 = vcmp.eq.s32.totalorder %v5309_v61, %v5702_v45  ;;  %v4956_v45 = vunpack.i.h.bf16 %v4954_v41  ;;  %v4955_v42 = vunpack.i.l.bf16 %v4954_v41 }
 0x42b   :  { %4141 = vmatprep.mubr.msk.f32.mxu0 %vm6711_vm13, %v6689_v29  ;;  %4503 = vmatpush3.bf16.msra.mxu0 %v4500_v16  ;;  %vm6722_vm13 = vcmp.eq.s32.totalorder %v5309_v61, %v5690_v37 }
 0x42c   :  { %4505 = vmatprep.subr.bf16.mxu0 %v4504_v32  ;;  %v4536_v37 = vpack.c.bf16 %v4956_v45, %v4955_v42  ;;  %v6767_v45 = vld [vmem:[#allocation28_spill] sm:$0xff] }
 0x42e   :  { %4142 = vmatmul.mubr.msk.f32.gmra.mrb[30].mxu0 %vm6712_vm3, %v6689_v29  ;;  %vm6723_vm3 = vcmp.eq.s32.totalorder %v5309_v61, %v5706_v57  ;;  %v6726_v57 = vld [vmem:[#allocation3_spill] sm:$0xff] }
 0x42f   :  { %4507 = vmatpush3.bf16.msra.mxu0 %v4504_v32  ;;  %4176 = vmatprep.mubr.msk.f32.mxu0 %vm6713_vm4, %v6689_v29  ;;  %vm6724_vm4 = vcmp.eq.s32.totalorder %v5309_v61, %v5730_v31  ;;  %v6730_v31 = vld [vmem:[#allocation5_spill] sm:$0xff] }
 0x430   :  { %4509 = vmatprep.subr.bf16.mxu0 %v4508_v15 }
 0x432   :  { %4177 = vmatmul.mubr.msk.f32.vlgmr.msra.gmra.mrb[16].mxu0 %vm6714_vm5, %v6689_v29  ;;  %vm6725_vm5 = vcmp.eq.s32.totalorder %v5309_v61, %v5746_v17  ;;  %v6732_v17 = vld [vmem:[#allocation7_spill] sm:$0xff] }
 0x433   :  { %4179 = vmatprep.mubr.msk.f32.mxu0 %vm6715_vm6, %v6689_v29  ;;  %4511 = vmatpush3.bf16.msra.mxu0 %v4508_v15  ;;  %vm6727_vm6 = vcmp.eq.s32.totalorder %v5309_v61, %v6726_v57 }
 0x434   :  { %4513 = vmatprep.subr.bf16.mxu0 %v4512_v21 }
 0x436   :  { %4180 = vmatmul.mubr.msk.f32.gmra.mrb[18].mxu0 %vm6716_vm7, %v6689_v29  ;;  %vm6729_vm7 = vcmp.eq.s32.totalorder %v5309_v61, %v6728_v48 }
 0x437   :  { %4182 = vmatprep.mubr.msk.f32.mxu0 %vm6717_vm8, %v6689_v29  ;;  %4515 = vmatpush3.bf16.msra.mxu0 %v4512_v21  ;;  %vm6731_vm8 = vcmp.eq.s32.totalorder %v5309_v61, %v6730_v31 }
 0x438   :  { %4517 = vmatprep.subr.bf16.mxu0 %v4516_v24 }
 0x43a   :  { %4183 = vmatmul.mubr.msk.f32.gmra.mrb[20].mxu0 %vm6718_vm9, %v6689_v29  ;;  %vm6733_vm9 = vcmp.eq.s32.totalorder %v5309_v61, %v6732_v17  ;;  %v6768_v17 = vld [vmem:[#allocation31_spill] sm:$0xff] }
 0x43b   :  { %4185 = vmatprep.mubr.msk.f32.mxu0 %vm6719_vm10, %v6689_v29  ;;  %4519 = vmatpush3.bf16.msra.mxu0 %v4516_v24  ;;  %vm6735_vm10 = vcmp.eq.s32.totalorder %v5309_v61, %v6734_v51 }
 0x43c   :  { %4521 = vmatprep.subr.bf16.mxu0 %v4520_v36 }
 0x43e   :  { %4186 = vmatmul.mubr.msk.f32.gmra.mrb[22].mxu0 %vm6720_vm11, %v6689_v29  ;;  %vm6737_vm11 = vcmp.eq.s32.totalorder %v5309_v61, %v6736_v54 }
 0x43f   :  { %4188 = vmatprep.mubr.msk.f32.mxu0 %vm6721_vm12, %v6689_v29  ;;  %4523 = vmatpush3.bf16.msra.mxu0 %v4520_v36  ;;  %vm6739_vm12 = vcmp.eq.s32.totalorder %v5309_v61, %v6738_v55 }
 0x440   :  { %4525 = vmatprep.subr.bf16.mxu0 %v4524_v47 }
 0x442   :  { %4189 = vmatmul.mubr.msk.f32.gmra.mrb[24].mxu0 %vm6722_vm13, %v6689_v29  ;;  %vm6741_vm13 = vcmp.eq.s32.totalorder %v5309_v61, %v6740_v56  ;;  %v6769_v56 = vld [vmem:[#allocation30_spill] sm:$0xff] }
 0x443   :  { %4191 = vmatprep.mubr.msk.f32.mxu0 %vm6723_vm3, %v6689_v29  ;;  %4527 = vmatpush3.bf16.msra.mxu0 %v4524_v47  ;;  %vm6743_vm3 = vcmp.eq.s32.totalorder %v5309_v61, %v6742_v58 }
 0x444   :  { %4529 = vmatprep.subr.bf16.mxu0 %v4528_v30 }
 0x446   :  { %4192 = vmatmul.mubr.msk.f32.gmra.mrb[26].mxu0 %vm6724_vm4, %v6689_v29  ;;  %vm6745_vm4 = vcmp.eq.s32.totalorder %v5309_v61, %v6744_v59 }
 0x447   :  { %4194 = vmatprep.mubr.msk.f32.mxu0 %vm6725_vm5, %v6689_v29  ;;  %4531 = vmatpush3.bf16.msra.mxu0 %v4528_v30  ;;  %vm6747_vm5 = vcmp.eq.s32.totalorder %v5309_v61, %v6746_v60 }
 0x448   :  { %4533 = vmatprep.subr.bf16.mxu0 %v4532_v27 }
 0x44a   :  { %4195 = vmatmul.mubr.msk.f32.gmra.mrb[28].mxu0 %vm6727_vm6, %v6689_v29  ;;  %vm6749_vm6 = vcmp.eq.s32.totalorder %v5309_v61, %v6748_v0 }
 0x44b   :  { %4197 = vmatprep.mubr.msk.f32.mxu0 %vm6729_vm7, %v6689_v29  ;;  %4535 = vmatpush3.bf16.msra.mxu0 %v4532_v27  ;;  %vm6751_vm7 = vcmp.eq.s32.totalorder %v5309_v61, %v6750_v1 }
 0x44c   :  { %4537 = vmatprep.subr.bf16.mxu0 %v4536_v37 }
 0x44e   :  { %4198 = vmatmul.mubr.msk.f32.gmra.mrb[30].mxu0 %vm6731_vm8, %v6689_v29  ;;  %vm6753_vm8 = vcmp.eq.s32.totalorder %v5309_v61, %v6752_v2  ;;  %v6770_v2 = vld [vmem:[#allocation33_spill] sm:$0xff] }
 0x44f   :  { %4539 = vmatpush3.bf16.msra.mxu0 %v4536_v37  ;;  %4232 = vmatprep.mubr.msk.f32.mxu0 %vm6733_vm9, %v6689_v29  ;;  %vm6756_vm9 = vcmp.eq.s32.totalorder %v5309_v61, %v6755_v7 }
 0x452   :  { %4233 = vmatmul.mubr.msk.f32.vlgmr.msra.gmra.mrb[16].mxu0 %vm6735_vm10, %v6689_v29 }
 0x453   :  { %4235 = vmatprep.mubr.msk.f32.mxu0 %vm6737_vm11, %v6689_v29 }
 0x456   :  { %4236 = vmatmul.mubr.msk.f32.gmra.mrb[18].mxu0 %vm6739_vm12, %v6689_v29 }
 0x457   :  { %4238 = vmatprep.mubr.msk.f32.mxu0 %vm6741_vm13, %v6689_v29 }
 0x45a   :  { %4239 = vmatmul.mubr.msk.f32.gmra.mrb[20].mxu0 %vm6743_vm3, %v6689_v29 }
 0x45b   :  { %4241 = vmatprep.mubr.msk.f32.mxu0 %vm6745_vm4, %v6689_v29 }
 0x45e   :  { %4242 = vmatmul.mubr.msk.f32.gmra.mrb[22].mxu0 %vm6747_vm5, %v6689_v29 }
 0x45f   :  { %4244 = vmatprep.mubr.msk.f32.mxu0 %vm6749_vm6, %v6689_v29 }
 0x462   :  { %4245 = vmatmul.mubr.msk.f32.gmra.mrb[24].mxu0 %vm6751_vm7, %v6689_v29 }
 0x463   :  { %4247 = vmatprep.mubr.msk.f32.mxu0 %vm6753_vm8, %v6689_v29 }
 0x466   :  { %4248 = vmatmul.mubr.msk.f32.gmra.mrb[26].mxu0 %vm495_vm15, %v6689_v29 }
 0x467   :  { %4250 = vmatprep.mubr.msk.f32.mxu0 %vm6756_vm9, %v6689_v29 }
 0x46a   :  { %4251 = vmatmul.mubr.msk.f32.gmra.mrb[28].mxu0 %vm497_vm1, %v6689_v29 }
 0x46b   :  { %4253 = vmatprep.mubr.msk.f32.mxu0 %vm498_vm2, %v6689_v29 }
 0x46e   :  { %4254 = vmatmul.mubr.msk.f32.gmra.mrb[30].mxu0 %vm499_vm14, %v6689_v29  ;;  %v6761_v29 = vld [vmem:[#allocation22_spill] sm:$0xff] }
 0x525   :  { %v4234_v34 = vpop.f32.mrb[16].mxu0 }
 0x526   :  { %v4556_v44 = vadd.f32 %v4234_v34, %v6456_v14  ;;  %v2949_v12 = vpop.f32.mrb[17].mxu0 }
 0x527   :  { %v4557_v11 = vadd.f32 %v6456_v14, %v2949_v12 }
 0x528   :  { %v3045_v23 = vmax.f32 %v4556_v44, 0.0 }
 0x529   :  { %v3044_v38 = vmax.f32 %v4557_v11, 0.0  ;;  %v4237_v16 = vpop.f32.mrb[18].mxu0 }
 0x52a   :  { %v3061_v40 = vadd.f32 %v3045_v23, %v6760_v13  ;;  %v4558_v18 = vadd.f32 %v4237_v16, %v6456_v14  ;;  %v2959_v61 = vpop.f32.mrb[19].mxu0  ;;  %v6772_v23 = vld [vmem:[#allocation35_spill] sm:$0xff] }
 0x52b   :  { %v3060_v8 = vadd.f32 %v3044_v38, %v6761_v29  ;;  %v4559_v9 = vadd.f32 %v6456_v14, %v2959_v61 }
 0x52c   :  { %3077 = vst.msk [vmem:[%s6563_s9 + $0x8] sm:$0xff] %vm585_vm0, %v3061_v40  ;;  %v3047_v32 = vmax.f32 %v4558_v18, 0.0  ;;  %v6773_v40 = vld [vmem:[#allocation34_spill] sm:$0xff] }
 0x52d   :  { %3076 = vst.msk [vmem:[%s6563_s9] sm:$0xff] %vm585_vm0, %v3060_v8  ;;  %v3046_v50 = vmax.f32 %v4559_v9, 0.0  ;;  %v4240_v15 = vpop.f32.mrb[20].mxu0  ;;  %v6774_v9 = vld [vmem:[#allocation37_spill] sm:$0xff] }
 0x52e   :  { %v3063_v63 = vadd.f32 %v3047_v32, %v6762_v52  ;;  %v4560_v49 = vadd.f32 %v4240_v15, %v6456_v14  ;;  %v2969_v53 = vpop.f32.mrb[21].mxu0 }
 0x52f   :  { %v3062_v21 = vadd.f32 %v3046_v50, %v6763_v26  ;;  %v4561_v62 = vadd.f32 %v6456_v14, %v2969_v53  ;;  %v6775_v50 = vld [vmem:[#allocation36_spill] sm:$0xff] }
 0x530   :  { %3079 = vst.msk [vmem:[%s6563_s9 + $0x18] sm:$0xff] %vm585_vm0, %v3063_v63  ;;  %v3049_v24 = vmax.f32 %v4560_v49, 0.0 }
 0x531   :  { %3078 = vst.msk [vmem:[%s6563_s9 + $0x10] sm:$0xff] %vm585_vm0, %v3062_v21  ;;  %v3048_v35 = vmax.f32 %v4561_v62, 0.0  ;;  %v4243_v25 = vpop.f32.mrb[22].mxu0 }
 0x532   :  { %v3065_v19 = vadd.f32 %v3049_v24, %v6764_v39  ;;  %v4562_v46 = vadd.f32 %v4243_v25, %v6456_v14  ;;  %v2979_v36 = vpop.f32.mrb[23].mxu0 }
 0x533   :  { %v3064_v47 = vadd.f32 %v3048_v35, %v6765_v43  ;;  %v4563_v6 = vadd.f32 %v6456_v14, %v2979_v36 }
 0x534   :  { %3081 = vst.msk [vmem:[%s6563_s9 + $0x28] sm:$0xff] %vm585_vm0, %v3065_v19  ;;  %v3051_v33 = vmax.f32 %v4562_v46, 0.0 }
 0x535   :  { %3080 = vst.msk [vmem:[%s6563_s9 + $0x20] sm:$0xff] %vm585_vm0, %v3064_v47  ;;  %v3050_v28 = vmax.f32 %v4563_v6, 0.0  ;;  %v4246_v20 = vpop.f32.mrb[24].mxu0 }
 0x536   :  { %v3067_v30 = vadd.f32 %v3051_v33, %v6766_v22  ;;  %v4564_v41 = vadd.f32 %v4246_v20, %v6456_v14  ;;  %v2989_v27 = vpop.f32.mrb[25].mxu0 }
 0x537   :  { %v3066_v42 = vadd.f32 %v3050_v28, %v6767_v45  ;;  %v4565_v37 = vadd.f32 %v6456_v14, %v2989_v27 }
 0x538   :  { %3083 = vst.msk [vmem:[%s6563_s9 + $0x38] sm:$0xff] %vm585_vm0, %v3067_v30  ;;  %v3053_v57 = vmax.f32 %v4564_v41, 0.0 }
 0x539   :  { %3082 = vst.msk [vmem:[%s6563_s9 + $0x30] sm:$0xff] %vm585_vm0, %v3066_v42  ;;  %v3052_v48 = vmax.f32 %v4565_v37, 0.0  ;;  %v4249_v31 = vpop.f32.mrb[26].mxu0 }
 0x53a   :  { %v3069_v51 = vadd.f32 %v3053_v57, %v6768_v17  ;;  %v4566_v54 = vadd.f32 %v4249_v31, %v6456_v14  ;;  %v2999_v55 = vpop.f32.mrb[27].mxu0 }
 0x53b   :  { %v3068_v58 = vadd.f32 %v3052_v48, %v6769_v56  ;;  %v4567_v59 = vadd.f32 %v6456_v14, %v2999_v55 }
 0x53c   :  { %3085 = vst.msk [vmem:[%s6563_s9 + $0x48] sm:$0xff] %vm585_vm0, %v3069_v51  ;;  %v3055_v60 = vmax.f32 %v4566_v54, 0.0 }
 0x53d   :  { %3084 = vst.msk [vmem:[%s6563_s9 + $0x40] sm:$0xff] %vm585_vm0, %v3068_v58  ;;  %v3054_v0 = vmax.f32 %v4567_v59, 0.0  ;;  %v4252_v1 = vpop.f32.mrb[28].mxu0 }
 0x53e   :  { %v3071_v5 = vadd.f32 %v3055_v60, %v6770_v2  ;;  %v4568_v7 = vadd.f32 %v4252_v1, %v6456_v14  ;;  %v3009_v3 = vpop.f32.mrb[29].mxu0 }
 0x53f   :  { %v3070_v10 = vadd.f32 %v3054_v0, %v6771_v4  ;;  %v4569_v34 = vadd.f32 %v6456_v14, %v3009_v3 }
 0x540   :  { %3087 = vst.msk [vmem:[%s6563_s9 + $0x58] sm:$0xff] %vm585_vm0, %v3071_v5  ;;  %v3057_v44 = vmax.f32 %v4568_v7, 0.0 }
 0x541   :  { %3086 = vst.msk [vmem:[%s6563_s9 + $0x50] sm:$0xff] %vm585_vm0, %v3070_v10  ;;  %v3056_v12 = vmax.f32 %v4569_v34, 0.0  ;;  %v4255_v11 = vpop.f32.mrb[30].mxu0 }
 0x542   :  { %v3073_v38 = vadd.f32 %v3057_v44, %v6772_v23  ;;  %v4570_v16 = vadd.f32 %v4255_v11, %v6456_v14  ;;  %v3019_v13 = vpop.f32.mrb[31].mxu0 }
 0x543   :  { %v3072_v18 = vadd.f32 %v3056_v12, %v6773_v40  ;;  %v4571_v61 = vadd.f32 %v6456_v14, %v3019_v13 }
 0x544   :  { %3089 = vst.msk [vmem:[%s6563_s9 + $0x68] sm:$0xff] %vm585_vm0, %v3073_v38  ;;  %v3059_v29 = vmax.f32 %v4570_v16, 0.0 }
 0x545   :  { %3088 = vst.msk [vmem:[%s6563_s9 + $0x60] sm:$0xff] %vm585_vm0, %v3072_v18  ;;  %v3058_v8 = vmax.f32 %v4571_v61, 0.0 }
 0x546   :  { %v3075_v32 = vadd.f32 %v3059_v29, %v6774_v9 }
 0x547   :  { %v3074_v15 = vadd.f32 %v3058_v8, %v6775_v50 }
 0x548   :  { %3091 = vst.msk [vmem:[%s6563_s9 + $0x78] sm:$0xff] %vm585_vm0, %v3075_v32 }
 0x549   :  { %3090 = vst.msk [vmem:[%s6563_s9 + $0x70] sm:$0xff] %vm585_vm0, %v3074_v15 }

</bundles_post_ra>
